<compile_context>
chip_gen: v7x
topology: tpu7x:2x2x1
jax: 0.10.0
libtpu: 0.0.40
codegen_flags: <defaults>
</compile_context>

<pallas_src>
import functools
import math

import jax
import jax.numpy as jnp
from jax.experimental import pallas as pl
from jax.experimental.pallas import tpu as pltpu


# ---------------------------------------------------------------------------
# Pallas kernel: full encoder stack, single grid step, layers unrolled.
# ---------------------------------------------------------------------------
def encoder_stack_kernel(
    x_ref,        # (B*S, D)   f32   embeddings + positional encodings
    wqkv_ref,     # (L, D, 3D) bf16  fused [Q|K|V] block-diagonal per-head proj (scale in Q)
    wo_ref,       # (L, D, D)  bf16  attention output projection
    bo_ref,       # (L, 1, D)  f32
    g1_ref,       # (L, 1, D)  f32   LayerNorm1 gamma
    be1_ref,      # (L, 1, D)  f32   LayerNorm1 beta
    w1_ref,       # (L, D, F)  bf16  FFN first linear
    b1_ref,       # (L, 1, F)  f32
    w2_ref,       # (L, F, D)  bf16  FFN second linear
    b2_ref,       # (L, 1, D)  f32
    g2_ref,       # (L, 1, D)  f32   LayerNorm2 gamma
    be2_ref,      # (L, 1, D)  f32   LayerNorm2 beta
    o_ref,        # (B*S, D)   f32   output (written once)
    *,
    batch: int,
    seq: int,
    n_heads: int,
    head_dim: int,
    num_layers: int,
):
    f32 = jnp.float32
    bf16 = jnp.bfloat16
    embed_dim = n_heads * head_dim
    bs = batch * seq

    x = x_ref[...]                                          # (BS, D) f32, carried in regs

    for li in range(num_layers):                            # static unroll over layers
        xb = x.astype(bf16)

        # --- fused Q/K/V projection: one MXU issue, N = 3D --------------------------
        # 1/sqrt(embed_dim) score scale pre-folded into the Q columns at pack time.
        qkv = jnp.dot(xb, wqkv_ref[li], preferred_element_type=f32)    # (BS, 3D) f32
        qkv3 = qkv.reshape(batch, seq, 3 * embed_dim)                  # leading-dim split

        wo_l = wo_ref[li]                                              # (D, D) bf16

        # --- attention: static head loop, wo folded in, f32 accumulator --------------
        acc = jnp.zeros((batch, seq, embed_dim), f32)
        for h in range(n_heads):
            lo = h * head_dim
            hi = lo + head_dim
            qh = qkv3[:, :, lo:hi].astype(bf16)                        # (B, S, Dh)
            kh = qkv3[:, :, embed_dim + lo:embed_dim + hi].astype(bf16)
            vh = qkv3[:, :, 2 * embed_dim + lo:2 * embed_dim + hi].astype(bf16)
            # Batched over B, contraction on last dim (no explicit transpose).
            s = jnp.einsum("bqd,bkd->bqk", qh, kh,
                           preferred_element_type=f32)                 # (B, S, S) f32
            s = s - jnp.max(s, axis=-1, keepdims=True)
            p = jnp.exp(s)
            p = p * pl.reciprocal(jnp.sum(p, axis=-1, keepdims=True), approx=True)
            ah = jnp.einsum("bqk,bkd->bqd", p.astype(bf16), vh,
                            preferred_element_type=f32)                # (B, S, Dh) f32
            # Fold the output projection: no head-assembly scratch / masked stores.
            acc = acc + jnp.einsum("bqd,de->bqe", ah.astype(bf16), wo_l[lo:hi, :],
                                   preferred_element_type=f32)         # (B, S, D) f32

        attn_out = acc.reshape(bs, embed_dim) + bo_ref[li]

        # --- residual + LayerNorm1 (f32) ---------------------------------------------
        # TODO(synk): nn.Dropout(0.1) treated as identity (eval-mode forward).
        y = attn_out + x
        mu = jnp.mean(y, axis=-1, keepdims=True)
        var = jnp.mean((y - mu) ** 2, axis=-1, keepdims=True)
        y = (y - mu) * jax.lax.rsqrt(var + 1e-5) * g1_ref[li] + be1_ref[li]

        # --- FFN + residual + LayerNorm2 (bf16 MXU operands, f32 accum/elementwise) --
        h1 = jnp.dot(y.astype(bf16), w1_ref[li], preferred_element_type=f32) + b1_ref[li]
        h1 = jnp.maximum(h1, 0.0)
        f = jnp.dot(h1.astype(bf16), w2_ref[li], preferred_element_type=f32) + b2_ref[li]
        z = f + y
        mu2 = jnp.mean(z, axis=-1, keepdims=True)
        var2 = jnp.mean((z - mu2) ** 2, axis=-1, keepdims=True)
        x = (z - mu2) * jax.lax.rsqrt(var2 + 1e-5) * g2_ref[li] + be2_ref[li]

    o_ref[...] = x                                            # single output store


def transformer_encoder_pallas(x, packed, n_heads):
    """x: (B, S, D) f32 activations (embed * sqrt(D) + PE). packed: stacked layer weights."""
    B, S, D = x.shape
    BS = B * S
    L = packed["wqkv"].shape[0]
    head_dim = D // n_heads

    kernel = functools.partial(
        encoder_stack_kernel,
        batch=B, seq=S, n_heads=n_heads, head_dim=head_dim, num_layers=L,
    )

    # No grid: all (tiny) stacked weights co-reside in VMEM as full arrays; the layer
    # loop is unrolled inside one kernel invocation.
    out = pl.pallas_call(
        kernel,
        out_shape=jax.ShapeDtypeStruct((BS, D), jnp.float32),
    )(
        x.reshape(BS, D),
        packed["wqkv"],
        packed["wo"], packed["bo"],
        packed["g1"], packed["be1"],
        packed["w1"], packed["b1"],
        packed["w2"], packed["b2"],
        packed["g2"], packed["be2"],
    )
    return out.reshape(B, S, D)


# ---------------------------------------------------------------------------
# Parameter construction / packing / glue
# ---------------------------------------------------------------------------
def make_positional_embedding(max_seq_len, embed_dim):
    """Matches the reference loop: pe[p, i] = sin(p/10000**(i/D)), pe[p, i+1] = cos(same)."""
    pos = jnp.arange(max_seq_len, dtype=jnp.float32)[:, None]
    i = jnp.arange(0, embed_dim, 2, dtype=jnp.float32)[None, :]
    angle = pos / jnp.power(10000.0, i / embed_dim)
    pe = jnp.zeros((max_seq_len, embed_dim), dtype=jnp.float32)
    pe = pe.at[:, 0::2].set(jnp.sin(angle))
    pe = pe.at[:, 1::2].set(jnp.cos(angle))
    return pe


def init_params(key, vocab_size, embed_dim, n_heads, num_layers, expansion_factor):
    head_dim = embed_dim // n_heads
    ff_dim = embed_dim * expansion_factor
    keys = jax.random.split(key, 1 + num_layers)
    params = {"embed_table": 0.05 * jax.random.normal(
        keys[0], (vocab_size, embed_dim), jnp.float32)}

    layers = []
    for li in range(num_layers):
        ks = jax.random.split(keys[1 + li], 8)
        # PyTorch Linear(head_dim, head_dim, bias=False) shared across heads.
        wq_t = 0.1 * jax.random.normal(ks[0], (head_dim, head_dim), jnp.float32)
        wk_t = 0.1 * jax.random.normal(ks[1], (head_dim, head_dim), jnp.float32)
        wv_t = 0.1 * jax.random.normal(ks[2], (head_dim, head_dim), jnp.float32)
        eye_h = jnp.eye(n_heads, dtype=jnp.float32)
        layers.append({
            "wq": jnp.kron(eye_h, wq_t),                    # (D, D) block-diagonal
            "wk": jnp.kron(eye_h, wk_t),
            "wv": jnp.kron(eye_h, wv_t),
            "wo": 0.1 * jax.random.normal(ks[3], (embed_dim, embed_dim), jnp.float32),
            "bo": 0.01 * jax.random.normal(ks[4], (1, embed_dim), jnp.float32),
            "g1": jnp.ones((1, embed_dim), jnp.float32),
            "be1": jnp.zeros((1, embed_dim), jnp.float32),
            "w1": 0.1 * jax.random.normal(ks[5], (embed_dim, ff_dim), jnp.float32),
            "b1": 0.01 * jax.random.normal(ks[6], (1, ff_dim), jnp.float32),
            "w2": 0.1 * jax.random.normal(ks[7], (ff_dim, embed_dim), jnp.float32),
            "b2": jnp.zeros((1, embed_dim), jnp.float32),
            "g2": jnp.ones((1, embed_dim), jnp.float32),
            "be2": jnp.zeros((1, embed_dim), jnp.float32),
        })
    params["layers"] = layers
    return params


def pack_layers_for_kernel(layers, embed_dim):
    """Stack per-layer params on a leading layer axis; fuse Q/K/V into one (L, D, 3D)
    bf16 weight (1/sqrt(embed_dim) attention scale folded into the Q columns); cast
    matmul weights to bf16."""
    scale = 1.0 / math.sqrt(embed_dim)
    stack = lambda name: jnp.stack([lp[name] for lp in layers], axis=0)
    wqkv = jnp.concatenate(
        [stack("wq") * scale, stack("wk"), stack("wv")], axis=-1)      # (L, D, 3D)
    return {
        "wqkv": wqkv.astype(jnp.bfloat16),
        "wo": stack("wo").astype(jnp.bfloat16),
        "bo": stack("bo"),
        "g1": stack("g1"), "be1": stack("be1"),
        "w1": stack("w1").astype(jnp.bfloat16),
        "b1": stack("b1"),
        "w2": stack("w2").astype(jnp.bfloat16),
        "b2": stack("b2"),
        "g2": stack("g2"), "be2": stack("be2"),
    }


def embed_and_pe(token_ids, params, pe):
    D = params["embed_table"].shape[1]
    S = token_ids.shape[1]
    embed = jnp.take(params["embed_table"], token_ids, axis=0)          # (B, S, D) glue
    return embed * math.sqrt(D) + pe[None, :S, :]


def transformer_encoder_forward(token_ids, params, packed, pe, n_heads):
    """token_ids: (B, S) int32 -> (B, S, D) float32 (Pallas hot path for all layers)."""
    x = embed_and_pe(token_ids, params, pe)
    return transformer_encoder_pallas(x, packed, n_heads)


# ---------------------------------------------------------------------------
# References:
#  * reference_forward  — pure f32, mirrors the PyTorch module exactly.
#  * mirrored_reference — same math / precision policy as the kernel (bf16 MXU operands,
#    f32 accumulation, scale folded into Q, wo folded per head) with exact softmax
#    division, for a tight logic check.
# ---------------------------------------------------------------------------
def reference_forward(token_ids, params, pe, n_heads):
    D = params["embed_table"].shape[1]
    S = token_ids.shape[1]
    out = jnp.take(params["embed_table"], token_ids, axis=0) * math.sqrt(D) + pe[None, :S, :]
    for lp in params["layers"]:
        x = out
        q = x @ lp["wq"]; k = x @ lp["wk"]; v = x @ lp["wv"]
        B, S_, D_ = x.shape
        H = n_heads; Dh = D_ // H
        qh = q.reshape(B, S_, H, Dh).transpose(0, 2, 1, 3)
        kh = k.reshape(B, S_, H, Dh).transpose(0, 2, 1, 3)
        vh = v.reshape(B, S_, H, Dh).transpose(0, 2, 1, 3)
        s = jnp.einsum("bhqd,bhkd->bhqk", qh, kh) / math.sqrt(D_)
        p = jax.nn.softmax(s, axis=-1)
        att = jnp.einsum("bhqk,bhkd->bhqd", p, vh).transpose(0, 2, 1, 3).reshape(B, S_, D_)
        attn_out = att @ lp["wo"] + lp["bo"]
        y = attn_out + x
        mu = y.mean(-1, keepdims=True); var = ((y - mu) ** 2).mean(-1, keepdims=True)
        y = (y - mu) / jnp.sqrt(var + 1e-5) * lp["g1"] + lp["be1"]
        f = jnp.maximum(y @ lp["w1"] + lp["b1"], 0.0) @ lp["w2"] + lp["b2"]
        z = f + y
        mu2 = z.mean(-1, keepdims=True); var2 = ((z - mu2) ** 2).mean(-1, keepdims=True)
        out = (z - mu2) / jnp.sqrt(var2 + 1e-5) * lp["g2"] + lp["be2"]
    return out


def mirrored_reference(x0, packed, n_heads):
    """Same math / precision policy as the Pallas kernel (softmax denom uses exact div)."""
    B, S, D = x0.shape
    H = n_heads; Dh = D // H
    BS = B * S
    bf16, f32 = jnp.bfloat16, jnp.float32
    x = x0.reshape(BS, D)
    L = packed["wqkv"].shape[0]
    for li in range(L):
        xb = x.astype(bf16)
        qkv = jnp.dot(xb, packed["wqkv"][li], preferred_element_type=f32)
        qkv3 = qkv.reshape(B, S, 3 * D)
        wo_l = packed["wo"][li]
        acc = jnp.zeros((B, S, D), f32)
        for h in range(H):
            lo, hi = h * Dh, (h + 1) * Dh
            qh = qkv3[:, :, lo:hi].astype(bf16)
            kh = qkv3[:, :, D + lo:D + hi].astype(bf16)
            vh = qkv3[:, :, 2 * D + lo:2 * D + hi].astype(bf16)
            s = jnp.einsum("bqd,bkd->bqk", qh, kh, preferred_element_type=f32)
            s = s - jnp.max(s, -1, keepdims=True)
            p = jnp.exp(s)
            p = p / jnp.sum(p, -1, keepdims=True)
            ah = jnp.einsum("bqk,bkd->bqd", p.astype(bf16), vh, preferred_element_type=f32)
            acc = acc + jnp.einsum("bqd,de->bqe", ah.astype(bf16), wo_l[lo:hi, :],
                                   preferred_element_type=f32)
        attn_out = acc.reshape(BS, D) + packed["bo"][li]
        y = attn_out + x
        mu = y.mean(-1, keepdims=True); var = ((y - mu) ** 2).mean(-1, keepdims=True)
        y = (y - mu) * jax.lax.rsqrt(var + 1e-5) * packed["g1"][li] + packed["be1"][li]
        h1 = jnp.maximum(jnp.dot(y.astype(bf16), packed["w1"][li],
                                 preferred_element_type=f32) + packed["b1"][li], 0.0)
        f = jnp.dot(h1.astype(bf16), packed["w2"][li],
                    preferred_element_type=f32) + packed["b2"][li]
        z = f + y
        mu2 = z.mean(-1, keepdims=True); var2 = ((z - mu2) ** 2).mean(-1, keepdims=True)
        x = (z - mu2) * jax.lax.rsqrt(var2 + 1e-5) * packed["g2"][li] + packed["be2"][li]
    return x.reshape(B, S, D)


if __name__ == "__main__":
    # Small shapes consistent with the module's forward.
    B, S = 2, 8
    max_seq_len, vocab_size = 16, 50
    embed_dim, n_heads, num_layers, expansion_factor = 32, 4, 2, 4

    key = jax.random.PRNGKey(0)
    k_tok, k_par = jax.random.split(key)
    token_ids = jax.random.randint(k_tok, (B, S), 0, vocab_size, dtype=jnp.int32)

    params = init_params(k_par, vocab_size, embed_dim, n_heads, num_layers, expansion_factor)
    pe = make_positional_embedding(max_seq_len, embed_dim)
    packed = pack_layers_for_kernel(params["layers"], embed_dim)

    out = transformer_encoder_forward(token_ids, params, packed, pe, n_heads)
    out = jax.block_until_ready(out)
    assert out.shape == (B, S, embed_dim)

    x0 = embed_and_pe(token_ids, params, pe)
    ref_mirror = jax.block_until_ready(mirrored_reference(x0, packed, n_heads))
    ref_f32 = jax.block_until_ready(reference_forward(token_ids, params, pe, n_heads))

    err_mirror = float(jnp.max(jnp.abs(out - ref_mirror)))
    err_f32 = float(jnp.max(jnp.abs(out - ref_f32)))
    # Tight check vs. a reference with the kernel's precision policy (logic check).
    assert jnp.allclose(out, ref_mirror, rtol=1e-2, atol=1e-2), err_mirror
    # Loose check vs. the full-f32 PyTorch-equivalent reference (bf16 MXU operands).
    assert jnp.allclose(out, ref_f32, rtol=5e-2, atol=5e-2), err_f32

    print("KERNEL_OK")
</pallas_src>

<mosaic_0001>
module attributes {stable_mosaic.version = 11 : i64} {
  func.func @encoder_stack_kernel(%arg0: memref<16x32xf32, #tpu.memory_space<vmem>>, %arg1: memref<2x32x96xbf16, #tpu.memory_space<vmem>>, %arg2: memref<2x32x32xbf16, #tpu.memory_space<vmem>>, %arg3: memref<2x1x32xf32, #tpu.memory_space<vmem>>, %arg4: memref<2x1x32xf32, #tpu.memory_space<vmem>>, %arg5: memref<2x1x32xf32, #tpu.memory_space<vmem>>, %arg6: memref<2x32x128xbf16, #tpu.memory_space<vmem>>, %arg7: memref<2x1x128xf32, #tpu.memory_space<vmem>>, %arg8: memref<2x128x32xbf16, #tpu.memory_space<vmem>>, %arg9: memref<2x1x32xf32, #tpu.memory_space<vmem>>, %arg10: memref<2x1x32xf32, #tpu.memory_space<vmem>>, %arg11: memref<2x1x32xf32, #tpu.memory_space<vmem>>, %arg12: memref<16x32xf32, #tpu.memory_space<vmem>>) attributes {dimension_semantics = [], scalar_prefetch = 0 : i64, scratch_operands = 0 : i64, tpu.core_type = #tpu.core_type<tc>} {
    %c0 = arith.constant 0 : index
    %c0_0 = arith.constant 0 : index
    %0 = vector.load %arg0[%c0, %c0_0] : memref<16x32xf32, #tpu.memory_space<vmem>>, vector<16x32xf32>
    %1 = arith.truncf %0 : vector<16x32xf32> to vector<16x32xbf16>
    %c0_1 = arith.constant 0 : index
    %c0_2 = arith.constant 0 : index
    %c0_3 = arith.constant 0 : index
    %2 = vector.load %arg1[%c0_1, %c0_2, %c0_3] : memref<2x32x96xbf16, #tpu.memory_space<vmem>>, vector<1x32x96xbf16>
    %3 = vector.shape_cast %2 : vector<1x32x96xbf16> to vector<32x96xbf16>
    %cst = arith.constant dense<0.000000e+00> : vector<16x96xf32>
    %4 = tpu.matmul %1, %3, %cst {dimension_numbers = #tpu.dot_dimension_numbers<[1], [0], [0], [1], [0, 0, 1, 1], [], []>} : vector<16x32xbf16>, vector<32x96xbf16>, vector<16x96xf32> -> vector<16x96xf32>
    %5 = vector.shape_cast %4 : vector<16x96xf32> to vector<2x8x96xf32>
    %c0_4 = arith.constant 0 : index
    %c0_5 = arith.constant 0 : index
    %c0_6 = arith.constant 0 : index
    %6 = vector.load %arg2[%c0_4, %c0_5, %c0_6] : memref<2x32x32xbf16, #tpu.memory_space<vmem>>, vector<1x32x32xbf16>
    %7 = vector.shape_cast %6 : vector<1x32x32xbf16> to vector<32x32xbf16>
    %cst_7 = arith.constant 0.000000e+00 : f32
    %8 = vector.broadcast %cst_7 : f32 to vector<2x8x32xf32>
    %9 = vector.extract_strided_slice %5 {offsets = [0, 0, 0], sizes = [2, 8, 8], strides = [1, 1, 1]} : vector<2x8x96xf32> to vector<2x8x8xf32>
    %10 = arith.truncf %9 : vector<2x8x8xf32> to vector<2x8x8xbf16>
    %11 = vector.extract_strided_slice %5 {offsets = [0, 0, 32], sizes = [2, 8, 8], strides = [1, 1, 1]} : vector<2x8x96xf32> to vector<2x8x8xf32>
    %12 = arith.truncf %11 : vector<2x8x8xf32> to vector<2x8x8xbf16>
    %13 = vector.extract_strided_slice %5 {offsets = [0, 0, 64], sizes = [2, 8, 8], strides = [1, 1, 1]} : vector<2x8x96xf32> to vector<2x8x8xf32>
    %14 = arith.truncf %13 : vector<2x8x8xf32> to vector<2x8x8xbf16>
    "tpu.trace_start"() <{level = 10 : i32, message = "bqd,bkd->bqk"}> : () -> ()
    %cst_8 = arith.constant dense<0.000000e+00> : vector<2x8x8xf32>
    %15 = tpu.matmul %10, %12, %cst_8 {dimension_numbers = #tpu.dot_dimension_numbers<[2], [2], [1], [1], [0, 0, 0, 1, 1, 1], [0], [0]>} : vector<2x8x8xbf16>, vector<2x8x8xbf16>, vector<2x8x8xf32> -> vector<2x8x8xf32>
    "tpu.trace_stop"() : () -> ()
    %cst_9 = arith.constant dense<0xFF800000> : vector<2x8xf32>
    %16 = vector.multi_reduction <maximumf>, %15, %cst_9 [2] : vector<2x8x8xf32> to vector<2x8xf32>
    %17 = vector.shape_cast %16 : vector<2x8xf32> to vector<2x8x1xf32>
    %18 = vector.broadcast %17 : vector<2x8x1xf32> to vector<2x8x8xf32>
    %19 = arith.subf %15, %18 : vector<2x8x8xf32>
    %20 = math.exp %19 : vector<2x8x8xf32>
    %cst_10 = arith.constant dense<0.000000e+00> : vector<2x8xf32>
    %21 = vector.multi_reduction <add>, %20, %cst_10 [2] : vector<2x8x8xf32> to vector<2x8xf32>
    %22 = vector.shape_cast %21 : vector<2x8xf32> to vector<2x8x1xf32>
    %23 = tpu.reciprocal %22 {approx = true} : vector<2x8x1xf32> -> vector<2x8x1xf32>
    %24 = vector.broadcast %23 : vector<2x8x1xf32> to vector<2x8x8xf32>
    %25 = arith.mulf %20, %24 : vector<2x8x8xf32>
    %26 = arith.truncf %25 : vector<2x8x8xf32> to vector<2x8x8xbf16>
    "tpu.trace_start"() <{level = 10 : i32, message = "bqk,bkd->bqd"}> : () -> ()
    %cst_11 = arith.constant dense<0.000000e+00> : vector<2x8x8xf32>
    %27 = tpu.matmul %26, %14, %cst_11 {dimension_numbers = #tpu.dot_dimension_numbers<[2], [1], [1], [2], [0, 0, 0, 1, 1, 2], [0], [0]>} : vector<2x8x8xbf16>, vector<2x8x8xbf16>, vector<2x8x8xf32> -> vector<2x8x8xf32>
    "tpu.trace_stop"() : () -> ()
    %28 = arith.truncf %27 : vector<2x8x8xf32> to vector<2x8x8xbf16>
    %29 = vector.extract_strided_slice %7 {offsets = [0, 0], sizes = [8, 32], strides = [1, 1]} : vector<32x32xbf16> to vector<8x32xbf16>
    "tpu.trace_start"() <{level = 10 : i32, message = "bqd,de->bqe"}> : () -> ()
    %cst_12 = arith.constant dense<0.000000e+00> : vector<2x8x32xf32>
    %30 = tpu.matmul %28, %29, %cst_12 {dimension_numbers = #tpu.dot_dimension_numbers<[2], [0], [0, 1], [1], [0, 0, 0, 1, 1, 1], [], []>} : vector<2x8x8xbf16>, vector<8x32xbf16>, vector<2x8x32xf32> -> vector<2x8x32xf32>
    "tpu.trace_stop"() : () -> ()
    %31 = arith.addf %8, %30 : vector<2x8x32xf32>
    %32 = vector.extract_strided_slice %5 {offsets = [0, 0, 8], sizes = [2, 8, 8], strides = [1, 1, 1]} : vector<2x8x96xf32> to vector<2x8x8xf32>
    %33 = arith.truncf %32 : vector<2x8x8xf32> to vector<2x8x8xbf16>
    %34 = vector.extract_strided_slice %5 {offsets = [0, 0, 40], sizes = [2, 8, 8], strides = [1, 1, 1]} : vector<2x8x96xf32> to vector<2x8x8xf32>
    %35 = arith.truncf %34 : vector<2x8x8xf32> to vector<2x8x8xbf16>
    %36 = vector.extract_strided_slice %5 {offsets = [0, 0, 72], sizes = [2, 8, 8], strides = [1, 1, 1]} : vector<2x8x96xf32> to vector<2x8x8xf32>
    %37 = arith.truncf %36 : vector<2x8x8xf32> to vector<2x8x8xbf16>
    "tpu.trace_start"() <{level = 10 : i32, message = "bqd,bkd->bqk"}> : () -> ()
    %cst_13 = arith.constant dense<0.000000e+00> : vector<2x8x8xf32>
    %38 = tpu.matmul %33, %35, %cst_13 {dimension_numbers = #tpu.dot_dimension_numbers<[2], [2], [1], [1], [0, 0, 0, 1, 1, 1], [0], [0]>} : vector<2x8x8xbf16>, vector<2x8x8xbf16>, vector<2x8x8xf32> -> vector<2x8x8xf32>
    "tpu.trace_stop"() : () -> ()
    %cst_14 = arith.constant dense<0xFF800000> : vector<2x8xf32>
    %39 = vector.multi_reduction <maximumf>, %38, %cst_14 [2] : vector<2x8x8xf32> to vector<2x8xf32>
    %40 = vector.shape_cast %39 : vector<2x8xf32> to vector<2x8x1xf32>
    %41 = vector.broadcast %40 : vector<2x8x1xf32> to vector<2x8x8xf32>
    %42 = arith.subf %38, %41 : vector<2x8x8xf32>
    %43 = math.exp %42 : vector<2x8x8xf32>
    %cst_15 = arith.constant dense<0.000000e+00> : vector<2x8xf32>
    %44 = vector.multi_reduction <add>, %43, %cst_15 [2] : vector<2x8x8xf32> to vector<2x8xf32>
    %45 = vector.shape_cast %44 : vector<2x8xf32> to vector<2x8x1xf32>
    %46 = tpu.reciprocal %45 {approx = true} : vector<2x8x1xf32> -> vector<2x8x1xf32>
    %47 = vector.broadcast %46 : vector<2x8x1xf32> to vector<2x8x8xf32>
    %48 = arith.mulf %43, %47 : vector<2x8x8xf32>
    %49 = arith.truncf %48 : vector<2x8x8xf32> to vector<2x8x8xbf16>
    "tpu.trace_start"() <{level = 10 : i32, message = "bqk,bkd->bqd"}> : () -> ()
    %cst_16 = arith.constant dense<0.000000e+00> : vector<2x8x8xf32>
    %50 = tpu.matmul %49, %37, %cst_16 {dimension_numbers = #tpu.dot_dimension_numbers<[2], [1], [1], [2], [0, 0, 0, 1, 1, 2], [0], [0]>} : vector<2x8x8xbf16>, vector<2x8x8xbf16>, vector<2x8x8xf32> -> vector<2x8x8xf32>
    "tpu.trace_stop"() : () -> ()
    %51 = arith.truncf %50 : vector<2x8x8xf32> to vector<2x8x8xbf16>
    %52 = vector.extract_strided_slice %7 {offsets = [8, 0], sizes = [8, 32], strides = [1, 1]} : vector<32x32xbf16> to vector<8x32xbf16>
    "tpu.trace_start"() <{level = 10 : i32, message = "bqd,de->bqe"}> : () -> ()
    %cst_17 = arith.constant dense<0.000000e+00> : vector<2x8x32xf32>
    %53 = tpu.matmul %51, %52, %cst_17 {dimension_numbers = #tpu.dot_dimension_numbers<[2], [0], [0, 1], [1], [0, 0, 0, 1, 1, 1], [], []>} : vector<2x8x8xbf16>, vector<8x32xbf16>, vector<2x8x32xf32> -> vector<2x8x32xf32>
    "tpu.trace_stop"() : () -> ()
    %54 = arith.addf %31, %53 : vector<2x8x32xf32>
    %55 = vector.extract_strided_slice %5 {offsets = [0, 0, 16], sizes = [2, 8, 8], strides = [1, 1, 1]} : vector<2x8x96xf32> to vector<2x8x8xf32>
    %56 = arith.truncf %55 : vector<2x8x8xf32> to vector<2x8x8xbf16>
    %57 = vector.extract_strided_slice %5 {offsets = [0, 0, 48], sizes = [2, 8, 8], strides = [1, 1, 1]} : vector<2x8x96xf32> to vector<2x8x8xf32>
    %58 = arith.truncf %57 : vector<2x8x8xf32> to vector<2x8x8xbf16>
    %59 = vector.extract_strided_slice %5 {offsets = [0, 0, 80], sizes = [2, 8, 8], strides = [1, 1, 1]} : vector<2x8x96xf32> to vector<2x8x8xf32>
    %60 = arith.truncf %59 : vector<2x8x8xf32> to vector<2x8x8xbf16>
    "tpu.trace_start"() <{level = 10 : i32, message = "bqd,bkd->bqk"}> : () -> ()
    %cst_18 = arith.constant dense<0.000000e+00> : vector<2x8x8xf32>
    %61 = tpu.matmul %56, %58, %cst_18 {dimension_numbers = #tpu.dot_dimension_numbers<[2], [2], [1], [1], [0, 0, 0, 1, 1, 1], [0], [0]>} : vector<2x8x8xbf16>, vector<2x8x8xbf16>, vector<2x8x8xf32> -> vector<2x8x8xf32>
    "tpu.trace_stop"() : () -> ()
    %cst_19 = arith.constant dense<0xFF800000> : vector<2x8xf32>
    %62 = vector.multi_reduction <maximumf>, %61, %cst_19 [2] : vector<2x8x8xf32> to vector<2x8xf32>
    %63 = vector.shape_cast %62 : vector<2x8xf32> to vector<2x8x1xf32>
    %64 = vector.broadcast %63 : vector<2x8x1xf32> to vector<2x8x8xf32>
    %65 = arith.subf %61, %64 : vector<2x8x8xf32>
    %66 = math.exp %65 : vector<2x8x8xf32>
    %cst_20 = arith.constant dense<0.000000e+00> : vector<2x8xf32>
    %67 = vector.multi_reduction <add>, %66, %cst_20 [2] : vector<2x8x8xf32> to vector<2x8xf32>
    %68 = vector.shape_cast %67 : vector<2x8xf32> to vector<2x8x1xf32>
    %69 = tpu.reciprocal %68 {approx = true} : vector<2x8x1xf32> -> vector<2x8x1xf32>
    %70 = vector.broadcast %69 : vector<2x8x1xf32> to vector<2x8x8xf32>
    %71 = arith.mulf %66, %70 : vector<2x8x8xf32>
    %72 = arith.truncf %71 : vector<2x8x8xf32> to vector<2x8x8xbf16>
    "tpu.trace_start"() <{level = 10 : i32, message = "bqk,bkd->bqd"}> : () -> ()
    %cst_21 = arith.constant dense<0.000000e+00> : vector<2x8x8xf32>
    %73 = tpu.matmul %72, %60, %cst_21 {dimension_numbers = #tpu.dot_dimension_numbers<[2], [1], [1], [2], [0, 0, 0, 1, 1, 2], [0], [0]>} : vector<2x8x8xbf16>, vector<2x8x8xbf16>, vector<2x8x8xf32> -> vector<2x8x8xf32>
    "tpu.trace_stop"() : () -> ()
    %74 = arith.truncf %73 : vector<2x8x8xf32> to vector<2x8x8xbf16>
    %75 = vector.extract_strided_slice %7 {offsets = [16, 0], sizes = [8, 32], strides = [1, 1]} : vector<32x32xbf16> to vector<8x32xbf16>
    "tpu.trace_start"() <{level = 10 : i32, message = "bqd,de->bqe"}> : () -> ()
    %cst_22 = arith.constant dense<0.000000e+00> : vector<2x8x32xf32>
    %76 = tpu.matmul %74, %75, %cst_22 {dimension_numbers = #tpu.dot_dimension_numbers<[2], [0], [0, 1], [1], [0, 0, 0, 1, 1, 1], [], []>} : vector<2x8x8xbf16>, vector<8x32xbf16>, vector<2x8x32xf32> -> vector<2x8x32xf32>
    "tpu.trace_stop"() : () -> ()
    %77 = arith.addf %54, %76 : vector<2x8x32xf32>
    %78 = vector.extract_strided_slice %5 {offsets = [0, 0, 24], sizes = [2, 8, 8], strides = [1, 1, 1]} : vector<2x8x96xf32> to vector<2x8x8xf32>
    %79 = arith.truncf %78 : vector<2x8x8xf32> to vector<2x8x8xbf16>
    %80 = vector.extract_strided_slice %5 {offsets = [0, 0, 56], sizes = [2, 8, 8], strides = [1, 1, 1]} : vector<2x8x96xf32> to vector<2x8x8xf32>
    %81 = arith.truncf %80 : vector<2x8x8xf32> to vector<2x8x8xbf16>
    %82 = vector.extract_strided_slice %5 {offsets = [0, 0, 88], sizes = [2, 8, 8], strides = [1, 1, 1]} : vector<2x8x96xf32> to vector<2x8x8xf32>
    %83 = arith.truncf %82 : vector<2x8x8xf32> to vector<2x8x8xbf16>
    "tpu.trace_start"() <{level = 10 : i32, message = "bqd,bkd->bqk"}> : () -> ()
    %cst_23 = arith.constant dense<0.000000e+00> : vector<2x8x8xf32>
    %84 = tpu.matmul %79, %81, %cst_23 {dimension_numbers = #tpu.dot_dimension_numbers<[2], [2], [1], [1], [0, 0, 0, 1, 1, 1], [0], [0]>} : vector<2x8x8xbf16>, vector<2x8x8xbf16>, vector<2x8x8xf32> -> vector<2x8x8xf32>
    "tpu.trace_stop"() : () -> ()
    %cst_24 = arith.constant dense<0xFF800000> : vector<2x8xf32>
    %85 = vector.multi_reduction <maximumf>, %84, %cst_24 [2] : vector<2x8x8xf32> to vector<2x8xf32>
    %86 = vector.shape_cast %85 : vector<2x8xf32> to vector<2x8x1xf32>
    %87 = vector.broadcast %86 : vector<2x8x1xf32> to vector<2x8x8xf32>
    %88 = arith.subf %84, %87 : vector<2x8x8xf32>
    %89 = math.exp %88 : vector<2x8x8xf32>
    %cst_25 = arith.constant dense<0.000000e+00> : vector<2x8xf32>
    %90 = vector.multi_reduction <add>, %89, %cst_25 [2] : vector<2x8x8xf32> to vector<2x8xf32>
    %91 = vector.shape_cast %90 : vector<2x8xf32> to vector<2x8x1xf32>
    %92 = tpu.reciprocal %91 {approx = true} : vector<2x8x1xf32> -> vector<2x8x1xf32>
    %93 = vector.broadcast %92 : vector<2x8x1xf32> to vector<2x8x8xf32>
    %94 = arith.mulf %89, %93 : vector<2x8x8xf32>
    %95 = arith.truncf %94 : vector<2x8x8xf32> to vector<2x8x8xbf16>
    "tpu.trace_start"() <{level = 10 : i32, message = "bqk,bkd->bqd"}> : () -> ()
    %cst_26 = arith.constant dense<0.000000e+00> : vector<2x8x8xf32>
    %96 = tpu.matmul %95, %83, %cst_26 {dimension_numbers = #tpu.dot_dimension_numbers<[2], [1], [1], [2], [0, 0, 0, 1, 1, 2], [0], [0]>} : vector<2x8x8xbf16>, vector<2x8x8xbf16>, vector<2x8x8xf32> -> vector<2x8x8xf32>
    "tpu.trace_stop"() : () -> ()
    %97 = arith.truncf %96 : vector<2x8x8xf32> to vector<2x8x8xbf16>
    %98 = vector.extract_strided_slice %7 {offsets = [24, 0], sizes = [8, 32], strides = [1, 1]} : vector<32x32xbf16> to vector<8x32xbf16>
    "tpu.trace_start"() <{level = 10 : i32, message = "bqd,de->bqe"}> : () -> ()
    %cst_27 = arith.constant dense<0.000000e+00> : vector<2x8x32xf32>
    %99 = tpu.matmul %97, %98, %cst_27 {dimension_numbers = #tpu.dot_dimension_numbers<[2], [0], [0, 1], [1], [0, 0, 0, 1, 1, 1], [], []>} : vector<2x8x8xbf16>, vector<8x32xbf16>, vector<2x8x32xf32> -> vector<2x8x32xf32>
    "tpu.trace_stop"() : () -> ()
    %100 = arith.addf %77, %99 : vector<2x8x32xf32>
    %101 = vector.shape_cast %100 : vector<2x8x32xf32> to vector<16x32xf32>
    %c0_28 = arith.constant 0 : index
    %c0_29 = arith.constant 0 : index
    %c0_30 = arith.constant 0 : index
    %102 = vector.load %arg3[%c0_28, %c0_29, %c0_30] : memref<2x1x32xf32, #tpu.memory_space<vmem>>, vector<1x1x32xf32>
    %103 = vector.shape_cast %102 : vector<1x1x32xf32> to vector<1x32xf32>
    %104 = vector.broadcast %103 : vector<1x32xf32> to vector<16x32xf32>
    %105 = arith.addf %101, %104 : vector<16x32xf32>
    %106 = arith.addf %105, %0 : vector<16x32xf32>
    %cst_31 = arith.constant dense<0.000000e+00> : vector<16xf32>
    %107 = vector.multi_reduction <add>, %106, %cst_31 [1] : vector<16x32xf32> to vector<16xf32>
    %108 = vector.shape_cast %107 : vector<16xf32> to vector<16x1xf32>
    %cst_32 = arith.constant 3.200000e+01 : f32
    %109 = vector.broadcast %cst_32 : f32 to vector<16x1xf32>
    %110 = arith.divf %108, %109 : vector<16x1xf32>
    %111 = vector.broadcast %110 : vector<16x1xf32> to vector<16x32xf32>
    %112 = arith.subf %106, %111 : vector<16x32xf32>
    %113 = arith.mulf %112, %112 : vector<16x32xf32>
    %cst_33 = arith.constant dense<0.000000e+00> : vector<16xf32>
    %114 = vector.multi_reduction <add>, %113, %cst_33 [1] : vector<16x32xf32> to vector<16xf32>
    %115 = vector.shape_cast %114 : vector<16xf32> to vector<16x1xf32>
    %cst_34 = arith.constant 3.200000e+01 : f32
    %116 = vector.broadcast %cst_34 : f32 to vector<16x1xf32>
    %117 = arith.divf %115, %116 : vector<16x1xf32>
    %118 = vector.broadcast %110 : vector<16x1xf32> to vector<16x32xf32>
    %119 = arith.subf %106, %118 : vector<16x32xf32>
    %cst_35 = arith.constant 9.99999974E-6 : f32
    %120 = vector.broadcast %cst_35 : f32 to vector<16x1xf32>
    %121 = arith.addf %117, %120 : vector<16x1xf32>
    %122 = math.rsqrt %121 : vector<16x1xf32>
    %123 = vector.broadcast %122 : vector<16x1xf32> to vector<16x32xf32>
    %124 = arith.mulf %119, %123 : vector<16x32xf32>
    %c0_36 = arith.constant 0 : index
    %c0_37 = arith.constant 0 : index
    %c0_38 = arith.constant 0 : index
    %125 = vector.load %arg4[%c0_36, %c0_37, %c0_38] : memref<2x1x32xf32, #tpu.memory_space<vmem>>, vector<1x1x32xf32>
    %126 = vector.shape_cast %125 : vector<1x1x32xf32> to vector<1x32xf32>
    %127 = vector.broadcast %126 : vector<1x32xf32> to vector<16x32xf32>
    %128 = arith.mulf %124, %127 : vector<16x32xf32>
    %c0_39 = arith.constant 0 : index
    %c0_40 = arith.constant 0 : index
    %c0_41 = arith.constant 0 : index
    %129 = vector.load %arg5[%c0_39, %c0_40, %c0_41] : memref<2x1x32xf32, #tpu.memory_space<vmem>>, vector<1x1x32xf32>
    %130 = vector.shape_cast %129 : vector<1x1x32xf32> to vector<1x32xf32>
    %131 = vector.broadcast %130 : vector<1x32xf32> to vector<16x32xf32>
    %132 = arith.addf %128, %131 : vector<16x32xf32>
    %133 = arith.truncf %132 : vector<16x32xf32> to vector<16x32xbf16>
    %c0_42 = arith.constant 0 : index
    %c0_43 = arith.constant 0 : index
    %c0_44 = arith.constant 0 : index
    %134 = vector.load %arg6[%c0_42, %c0_43, %c0_44] : memref<2x32x128xbf16, #tpu.memory_space<vmem>>, vector<1x32x128xbf16>
    %135 = vector.shape_cast %134 : vector<1x32x128xbf16> to vector<32x128xbf16>
    %cst_45 = arith.constant dense<0.000000e+00> : vector<16x128xf32>
    %136 = tpu.matmul %133, %135, %cst_45 {dimension_numbers = #tpu.dot_dimension_numbers<[1], [0], [0], [1], [0, 0, 1, 1], [], []>} : vector<16x32xbf16>, vector<32x128xbf16>, vector<16x128xf32> -> vector<16x128xf32>
    %c0_46 = arith.constant 0 : index
    %c0_47 = arith.constant 0 : index
    %c0_48 = arith.constant 0 : index
    %137 = vector.load %arg7[%c0_46, %c0_47, %c0_48] : memref<2x1x128xf32, #tpu.memory_space<vmem>>, vector<1x1x128xf32>
    %138 = vector.shape_cast %137 : vector<1x1x128xf32> to vector<1x128xf32>
    %139 = vector.broadcast %138 : vector<1x128xf32> to vector<16x128xf32>
    %140 = arith.addf %136, %139 : vector<16x128xf32>
    %cst_49 = arith.constant 0.000000e+00 : f32
    %141 = vector.broadcast %cst_49 : f32 to vector<16x128xf32>
    %142 = arith.maximumf %140, %141 : vector<16x128xf32>
    %143 = arith.truncf %142 : vector<16x128xf32> to vector<16x128xbf16>
    %c0_50 = arith.constant 0 : index
    %c0_51 = arith.constant 0 : index
    %c0_52 = arith.constant 0 : index
    %144 = vector.load %arg8[%c0_50, %c0_51, %c0_52] : memref<2x128x32xbf16, #tpu.memory_space<vmem>>, vector<1x128x32xbf16>
    %145 = vector.shape_cast %144 : vector<1x128x32xbf16> to vector<128x32xbf16>
    %cst_53 = arith.constant dense<0.000000e+00> : vector<16x32xf32>
    %146 = tpu.matmul %143, %145, %cst_53 {dimension_numbers = #tpu.dot_dimension_numbers<[1], [0], [0], [1], [0, 0, 1, 1], [], []>} : vector<16x128xbf16>, vector<128x32xbf16>, vector<16x32xf32> -> vector<16x32xf32>
    %c0_54 = arith.constant 0 : index
    %c0_55 = arith.constant 0 : index
    %c0_56 = arith.constant 0 : index
    %147 = vector.load %arg9[%c0_54, %c0_55, %c0_56] : memref<2x1x32xf32, #tpu.memory_space<vmem>>, vector<1x1x32xf32>
    %148 = vector.shape_cast %147 : vector<1x1x32xf32> to vector<1x32xf32>
    %149 = vector.broadcast %148 : vector<1x32xf32> to vector<16x32xf32>
    %150 = arith.addf %146, %149 : vector<16x32xf32>
    %151 = arith.addf %150, %132 : vector<16x32xf32>
    %cst_57 = arith.constant dense<0.000000e+00> : vector<16xf32>
    %152 = vector.multi_reduction <add>, %151, %cst_57 [1] : vector<16x32xf32> to vector<16xf32>
    %153 = vector.shape_cast %152 : vector<16xf32> to vector<16x1xf32>
    %cst_58 = arith.constant 3.200000e+01 : f32
    %154 = vector.broadcast %cst_58 : f32 to vector<16x1xf32>
    %155 = arith.divf %153, %154 : vector<16x1xf32>
    %156 = vector.broadcast %155 : vector<16x1xf32> to vector<16x32xf32>
    %157 = arith.subf %151, %156 : vector<16x32xf32>
    %158 = arith.mulf %157, %157 : vector<16x32xf32>
    %cst_59 = arith.constant dense<0.000000e+00> : vector<16xf32>
    %159 = vector.multi_reduction <add>, %158, %cst_59 [1] : vector<16x32xf32> to vector<16xf32>
    %160 = vector.shape_cast %159 : vector<16xf32> to vector<16x1xf32>
    %cst_60 = arith.constant 3.200000e+01 : f32
    %161 = vector.broadcast %cst_60 : f32 to vector<16x1xf32>
    %162 = arith.divf %160, %161 : vector<16x1xf32>
    %163 = vector.broadcast %155 : vector<16x1xf32> to vector<16x32xf32>
    %164 = arith.subf %151, %163 : vector<16x32xf32>
    %cst_61 = arith.constant 9.99999974E-6 : f32
    %165 = vector.broadcast %cst_61 : f32 to vector<16x1xf32>
    %166 = arith.addf %162, %165 : vector<16x1xf32>
    %167 = math.rsqrt %166 : vector<16x1xf32>
    %168 = vector.broadcast %167 : vector<16x1xf32> to vector<16x32xf32>
    %169 = arith.mulf %164, %168 : vector<16x32xf32>
    %c0_62 = arith.constant 0 : index
    %c0_63 = arith.constant 0 : index
    %c0_64 = arith.constant 0 : index
    %170 = vector.load %arg10[%c0_62, %c0_63, %c0_64] : memref<2x1x32xf32, #tpu.memory_space<vmem>>, vector<1x1x32xf32>
    %171 = vector.shape_cast %170 : vector<1x1x32xf32> to vector<1x32xf32>
    %172 = vector.broadcast %171 : vector<1x32xf32> to vector<16x32xf32>
    %173 = arith.mulf %169, %172 : vector<16x32xf32>
    %c0_65 = arith.constant 0 : index
    %c0_66 = arith.constant 0 : index
    %c0_67 = arith.constant 0 : index
    %174 = vector.load %arg11[%c0_65, %c0_66, %c0_67] : memref<2x1x32xf32, #tpu.memory_space<vmem>>, vector<1x1x32xf32>
    %175 = vector.shape_cast %174 : vector<1x1x32xf32> to vector<1x32xf32>
    %176 = vector.broadcast %175 : vector<1x32xf32> to vector<16x32xf32>
    %177 = arith.addf %173, %176 : vector<16x32xf32>
    %178 = arith.truncf %177 : vector<16x32xf32> to vector<16x32xbf16>
    %c1 = arith.constant 1 : index
    %c0_68 = arith.constant 0 : index
    %c0_69 = arith.constant 0 : index
    %179 = vector.load %arg1[%c1, %c0_68, %c0_69] : memref<2x32x96xbf16, #tpu.memory_space<vmem>>, vector<1x32x96xbf16>
    %180 = vector.shape_cast %179 : vector<1x32x96xbf16> to vector<32x96xbf16>
    %cst_70 = arith.constant dense<0.000000e+00> : vector<16x96xf32>
    %181 = tpu.matmul %178, %180, %cst_70 {dimension_numbers = #tpu.dot_dimension_numbers<[1], [0], [0], [1], [0, 0, 1, 1], [], []>} : vector<16x32xbf16>, vector<32x96xbf16>, vector<16x96xf32> -> vector<16x96xf32>
    %182 = vector.shape_cast %181 : vector<16x96xf32> to vector<2x8x96xf32>
    %c1_71 = arith.constant 1 : index
    %c0_72 = arith.constant 0 : index
    %c0_73 = arith.constant 0 : index
    %183 = vector.load %arg2[%c1_71, %c0_72, %c0_73] : memref<2x32x32xbf16, #tpu.memory_space<vmem>>, vector<1x32x32xbf16>
    %184 = vector.shape_cast %183 : vector<1x32x32xbf16> to vector<32x32xbf16>
    %cst_74 = arith.constant 0.000000e+00 : f32
    %185 = vector.broadcast %cst_74 : f32 to vector<2x8x32xf32>
    %186 = vector.extract_strided_slice %182 {offsets = [0, 0, 0], sizes = [2, 8, 8], strides = [1, 1, 1]} : vector<2x8x96xf32> to vector<2x8x8xf32>
    %187 = arith.truncf %186 : vector<2x8x8xf32> to vector<2x8x8xbf16>
    %188 = vector.extract_strided_slice %182 {offsets = [0, 0, 32], sizes = [2, 8, 8], strides = [1, 1, 1]} : vector<2x8x96xf32> to vector<2x8x8xf32>
    %189 = arith.truncf %188 : vector<2x8x8xf32> to vector<2x8x8xbf16>
    %190 = vector.extract_strided_slice %182 {offsets = [0, 0, 64], sizes = [2, 8, 8], strides = [1, 1, 1]} : vector<2x8x96xf32> to vector<2x8x8xf32>
    %191 = arith.truncf %190 : vector<2x8x8xf32> to vector<2x8x8xbf16>
    "tpu.trace_start"() <{level = 10 : i32, message = "bqd,bkd->bqk"}> : () -> ()
    %cst_75 = arith.constant dense<0.000000e+00> : vector<2x8x8xf32>
    %192 = tpu.matmul %187, %189, %cst_75 {dimension_numbers = #tpu.dot_dimension_numbers<[2], [2], [1], [1], [0, 0, 0, 1, 1, 1], [0], [0]>} : vector<2x8x8xbf16>, vector<2x8x8xbf16>, vector<2x8x8xf32> -> vector<2x8x8xf32>
    "tpu.trace_stop"() : () -> ()
    %cst_76 = arith.constant dense<0xFF800000> : vector<2x8xf32>
    %193 = vector.multi_reduction <maximumf>, %192, %cst_76 [2] : vector<2x8x8xf32> to vector<2x8xf32>
    %194 = vector.shape_cast %193 : vector<2x8xf32> to vector<2x8x1xf32>
    %195 = vector.broadcast %194 : vector<2x8x1xf32> to vector<2x8x8xf32>
    %196 = arith.subf %192, %195 : vector<2x8x8xf32>
    %197 = math.exp %196 : vector<2x8x8xf32>
    %cst_77 = arith.constant dense<0.000000e+00> : vector<2x8xf32>
    %198 = vector.multi_reduction <add>, %197, %cst_77 [2] : vector<2x8x8xf32> to vector<2x8xf32>
    %199 = vector.shape_cast %198 : vector<2x8xf32> to vector<2x8x1xf32>
    %200 = tpu.reciprocal %199 {approx = true} : vector<2x8x1xf32> -> vector<2x8x1xf32>
    %201 = vector.broadcast %200 : vector<2x8x1xf32> to vector<2x8x8xf32>
    %202 = arith.mulf %197, %201 : vector<2x8x8xf32>
    %203 = arith.truncf %202 : vector<2x8x8xf32> to vector<2x8x8xbf16>
    "tpu.trace_start"() <{level = 10 : i32, message = "bqk,bkd->bqd"}> : () -> ()
    %cst_78 = arith.constant dense<0.000000e+00> : vector<2x8x8xf32>
    %204 = tpu.matmul %203, %191, %cst_78 {dimension_numbers = #tpu.dot_dimension_numbers<[2], [1], [1], [2], [0, 0, 0, 1, 1, 2], [0], [0]>} : vector<2x8x8xbf16>, vector<2x8x8xbf16>, vector<2x8x8xf32> -> vector<2x8x8xf32>
    "tpu.trace_stop"() : () -> ()
    %205 = arith.truncf %204 : vector<2x8x8xf32> to vector<2x8x8xbf16>
    %206 = vector.extract_strided_slice %184 {offsets = [0, 0], sizes = [8, 32], strides = [1, 1]} : vector<32x32xbf16> to vector<8x32xbf16>
    "tpu.trace_start"() <{level = 10 : i32, message = "bqd,de->bqe"}> : () -> ()
    %cst_79 = arith.constant dense<0.000000e+00> : vector<2x8x32xf32>
    %207 = tpu.matmul %205, %206, %cst_79 {dimension_numbers = #tpu.dot_dimension_numbers<[2], [0], [0, 1], [1], [0, 0, 0, 1, 1, 1], [], []>} : vector<2x8x8xbf16>, vector<8x32xbf16>, vector<2x8x32xf32> -> vector<2x8x32xf32>
    "tpu.trace_stop"() : () -> ()
    %208 = arith.addf %185, %207 : vector<2x8x32xf32>
    %209 = vector.extract_strided_slice %182 {offsets = [0, 0, 8], sizes = [2, 8, 8], strides = [1, 1, 1]} : vector<2x8x96xf32> to vector<2x8x8xf32>
    %210 = arith.truncf %209 : vector<2x8x8xf32> to vector<2x8x8xbf16>
    %211 = vector.extract_strided_slice %182 {offsets = [0, 0, 40], sizes = [2, 8, 8], strides = [1, 1, 1]} : vector<2x8x96xf32> to vector<2x8x8xf32>
    %212 = arith.truncf %211 : vector<2x8x8xf32> to vector<2x8x8xbf16>
    %213 = vector.extract_strided_slice %182 {offsets = [0, 0, 72], sizes = [2, 8, 8], strides = [1, 1, 1]} : vector<2x8x96xf32> to vector<2x8x8xf32>
    %214 = arith.truncf %213 : vector<2x8x8xf32> to vector<2x8x8xbf16>
    "tpu.trace_start"() <{level = 10 : i32, message = "bqd,bkd->bqk"}> : () -> ()
    %cst_80 = arith.constant dense<0.000000e+00> : vector<2x8x8xf32>
    %215 = tpu.matmul %210, %212, %cst_80 {dimension_numbers = #tpu.dot_dimension_numbers<[2], [2], [1], [1], [0, 0, 0, 1, 1, 1], [0], [0]>} : vector<2x8x8xbf16>, vector<2x8x8xbf16>, vector<2x8x8xf32> -> vector<2x8x8xf32>
    "tpu.trace_stop"() : () -> ()
    %cst_81 = arith.constant dense<0xFF800000> : vector<2x8xf32>
    %216 = vector.multi_reduction <maximumf>, %215, %cst_81 [2] : vector<2x8x8xf32> to vector<2x8xf32>
    %217 = vector.shape_cast %216 : vector<2x8xf32> to vector<2x8x1xf32>
    %218 = vector.broadcast %217 : vector<2x8x1xf32> to vector<2x8x8xf32>
    %219 = arith.subf %215, %218 : vector<2x8x8xf32>
    %220 = math.exp %219 : vector<2x8x8xf32>
    %cst_82 = arith.constant dense<0.000000e+00> : vector<2x8xf32>
    %221 = vector.multi_reduction <add>, %220, %cst_82 [2] : vector<2x8x8xf32> to vector<2x8xf32>
    %222 = vector.shape_cast %221 : vector<2x8xf32> to vector<2x8x1xf32>
    %223 = tpu.reciprocal %222 {approx = true} : vector<2x8x1xf32> -> vector<2x8x1xf32>
    %224 = vector.broadcast %223 : vector<2x8x1xf32> to vector<2x8x8xf32>
    %225 = arith.mulf %220, %224 : vector<2x8x8xf32>
    %226 = arith.truncf %225 : vector<2x8x8xf32> to vector<2x8x8xbf16>
    "tpu.trace_start"() <{level = 10 : i32, message = "bqk,bkd->bqd"}> : () -> ()
    %cst_83 = arith.constant dense<0.000000e+00> : vector<2x8x8xf32>
    %227 = tpu.matmul %226, %214, %cst_83 {dimension_numbers = #tpu.dot_dimension_numbers<[2], [1], [1], [2], [0, 0, 0, 1, 1, 2], [0], [0]>} : vector<2x8x8xbf16>, vector<2x8x8xbf16>, vector<2x8x8xf32> -> vector<2x8x8xf32>
    "tpu.trace_stop"() : () -> ()
    %228 = arith.truncf %227 : vector<2x8x8xf32> to vector<2x8x8xbf16>
    %229 = vector.extract_strided_slice %184 {offsets = [8, 0], sizes = [8, 32], strides = [1, 1]} : vector<32x32xbf16> to vector<8x32xbf16>
    "tpu.trace_start"() <{level = 10 : i32, message = "bqd,de->bqe"}> : () -> ()
    %cst_84 = arith.constant dense<0.000000e+00> : vector<2x8x32xf32>
    %230 = tpu.matmul %228, %229, %cst_84 {dimension_numbers = #tpu.dot_dimension_numbers<[2], [0], [0, 1], [1], [0, 0, 0, 1, 1, 1], [], []>} : vector<2x8x8xbf16>, vector<8x32xbf16>, vector<2x8x32xf32> -> vector<2x8x32xf32>
    "tpu.trace_stop"() : () -> ()
    %231 = arith.addf %208, %230 : vector<2x8x32xf32>
    %232 = vector.extract_strided_slice %182 {offsets = [0, 0, 16], sizes = [2, 8, 8], strides = [1, 1, 1]} : vector<2x8x96xf32> to vector<2x8x8xf32>
    %233 = arith.truncf %232 : vector<2x8x8xf32> to vector<2x8x8xbf16>
    %234 = vector.extract_strided_slice %182 {offsets = [0, 0, 48], sizes = [2, 8, 8], strides = [1, 1, 1]} : vector<2x8x96xf32> to vector<2x8x8xf32>
    %235 = arith.truncf %234 : vector<2x8x8xf32> to vector<2x8x8xbf16>
    %236 = vector.extract_strided_slice %182 {offsets = [0, 0, 80], sizes = [2, 8, 8], strides = [1, 1, 1]} : vector<2x8x96xf32> to vector<2x8x8xf32>
    %237 = arith.truncf %236 : vector<2x8x8xf32> to vector<2x8x8xbf16>
    "tpu.trace_start"() <{level = 10 : i32, message = "bqd,bkd->bqk"}> : () -> ()
    %cst_85 = arith.constant dense<0.000000e+00> : vector<2x8x8xf32>
    %238 = tpu.matmul %233, %235, %cst_85 {dimension_numbers = #tpu.dot_dimension_numbers<[2], [2], [1], [1], [0, 0, 0, 1, 1, 1], [0], [0]>} : vector<2x8x8xbf16>, vector<2x8x8xbf16>, vector<2x8x8xf32> -> vector<2x8x8xf32>
    "tpu.trace_stop"() : () -> ()
    %cst_86 = arith.constant dense<0xFF800000> : vector<2x8xf32>
    %239 = vector.multi_reduction <maximumf>, %238, %cst_86 [2] : vector<2x8x8xf32> to vector<2x8xf32>
    %240 = vector.shape_cast %239 : vector<2x8xf32> to vector<2x8x1xf32>
    %241 = vector.broadcast %240 : vector<2x8x1xf32> to vector<2x8x8xf32>
    %242 = arith.subf %238, %241 : vector<2x8x8xf32>
    %243 = math.exp %242 : vector<2x8x8xf32>
    %cst_87 = arith.constant dense<0.000000e+00> : vector<2x8xf32>
    %244 = vector.multi_reduction <add>, %243, %cst_87 [2] : vector<2x8x8xf32> to vector<2x8xf32>
    %245 = vector.shape_cast %244 : vector<2x8xf32> to vector<2x8x1xf32>
    %246 = tpu.reciprocal %245 {approx = true} : vector<2x8x1xf32> -> vector<2x8x1xf32>
    %247 = vector.broadcast %246 : vector<2x8x1xf32> to vector<2x8x8xf32>
    %248 = arith.mulf %243, %247 : vector<2x8x8xf32>
    %249 = arith.truncf %248 : vector<2x8x8xf32> to vector<2x8x8xbf16>
    "tpu.trace_start"() <{level = 10 : i32, message = "bqk,bkd->bqd"}> : () -> ()
    %cst_88 = arith.constant dense<0.000000e+00> : vector<2x8x8xf32>
    %250 = tpu.matmul %249, %237, %cst_88 {dimension_numbers = #tpu.dot_dimension_numbers<[2], [1], [1], [2], [0, 0, 0, 1, 1, 2], [0], [0]>} : vector<2x8x8xbf16>, vector<2x8x8xbf16>, vector<2x8x8xf32> -> vector<2x8x8xf32>
    "tpu.trace_stop"() : () -> ()
    %251 = arith.truncf %250 : vector<2x8x8xf32> to vector<2x8x8xbf16>
    %252 = vector.extract_strided_slice %184 {offsets = [16, 0], sizes = [8, 32], strides = [1, 1]} : vector<32x32xbf16> to vector<8x32xbf16>
    "tpu.trace_start"() <{level = 10 : i32, message = "bqd,de->bqe"}> : () -> ()
    %cst_89 = arith.constant dense<0.000000e+00> : vector<2x8x32xf32>
    %253 = tpu.matmul %251, %252, %cst_89 {dimension_numbers = #tpu.dot_dimension_numbers<[2], [0], [0, 1], [1], [0, 0, 0, 1, 1, 1], [], []>} : vector<2x8x8xbf16>, vector<8x32xbf16>, vector<2x8x32xf32> -> vector<2x8x32xf32>
    "tpu.trace_stop"() : () -> ()
    %254 = arith.addf %231, %253 : vector<2x8x32xf32>
    %255 = vector.extract_strided_slice %182 {offsets = [0, 0, 24], sizes = [2, 8, 8], strides = [1, 1, 1]} : vector<2x8x96xf32> to vector<2x8x8xf32>
    %256 = arith.truncf %255 : vector<2x8x8xf32> to vector<2x8x8xbf16>
    %257 = vector.extract_strided_slice %182 {offsets = [0, 0, 56], sizes = [2, 8, 8], strides = [1, 1, 1]} : vector<2x8x96xf32> to vector<2x8x8xf32>
    %258 = arith.truncf %257 : vector<2x8x8xf32> to vector<2x8x8xbf16>
    %259 = vector.extract_strided_slice %182 {offsets = [0, 0, 88], sizes = [2, 8, 8], strides = [1, 1, 1]} : vector<2x8x96xf32> to vector<2x8x8xf32>
    %260 = arith.truncf %259 : vector<2x8x8xf32> to vector<2x8x8xbf16>
    "tpu.trace_start"() <{level = 10 : i32, message = "bqd,bkd->bqk"}> : () -> ()
    %cst_90 = arith.constant dense<0.000000e+00> : vector<2x8x8xf32>
    %261 = tpu.matmul %256, %258, %cst_90 {dimension_numbers = #tpu.dot_dimension_numbers<[2], [2], [1], [1], [0, 0, 0, 1, 1, 1], [0], [0]>} : vector<2x8x8xbf16>, vector<2x8x8xbf16>, vector<2x8x8xf32> -> vector<2x8x8xf32>
    "tpu.trace_stop"() : () -> ()
    %cst_91 = arith.constant dense<0xFF800000> : vector<2x8xf32>
    %262 = vector.multi_reduction <maximumf>, %261, %cst_91 [2] : vector<2x8x8xf32> to vector<2x8xf32>
    %263 = vector.shape_cast %262 : vector<2x8xf32> to vector<2x8x1xf32>
    %264 = vector.broadcast %263 : vector<2x8x1xf32> to vector<2x8x8xf32>
    %265 = arith.subf %261, %264 : vector<2x8x8xf32>
    %266 = math.exp %265 : vector<2x8x8xf32>
    %cst_92 = arith.constant dense<0.000000e+00> : vector<2x8xf32>
    %267 = vector.multi_reduction <add>, %266, %cst_92 [2] : vector<2x8x8xf32> to vector<2x8xf32>
    %268 = vector.shape_cast %267 : vector<2x8xf32> to vector<2x8x1xf32>
    %269 = tpu.reciprocal %268 {approx = true} : vector<2x8x1xf32> -> vector<2x8x1xf32>
    %270 = vector.broadcast %269 : vector<2x8x1xf32> to vector<2x8x8xf32>
    %271 = arith.mulf %266, %270 : vector<2x8x8xf32>
    %272 = arith.truncf %271 : vector<2x8x8xf32> to vector<2x8x8xbf16>
    "tpu.trace_start"() <{level = 10 : i32, message = "bqk,bkd->bqd"}> : () -> ()
    %cst_93 = arith.constant dense<0.000000e+00> : vector<2x8x8xf32>
    %273 = tpu.matmul %272, %260, %cst_93 {dimension_numbers = #tpu.dot_dimension_numbers<[2], [1], [1], [2], [0, 0, 0, 1, 1, 2], [0], [0]>} : vector<2x8x8xbf16>, vector<2x8x8xbf16>, vector<2x8x8xf32> -> vector<2x8x8xf32>
    "tpu.trace_stop"() : () -> ()
    %274 = arith.truncf %273 : vector<2x8x8xf32> to vector<2x8x8xbf16>
    %275 = vector.extract_strided_slice %184 {offsets = [24, 0], sizes = [8, 32], strides = [1, 1]} : vector<32x32xbf16> to vector<8x32xbf16>
    "tpu.trace_start"() <{level = 10 : i32, message = "bqd,de->bqe"}> : () -> ()
    %cst_94 = arith.constant dense<0.000000e+00> : vector<2x8x32xf32>
    %276 = tpu.matmul %274, %275, %cst_94 {dimension_numbers = #tpu.dot_dimension_numbers<[2], [0], [0, 1], [1], [0, 0, 0, 1, 1, 1], [], []>} : vector<2x8x8xbf16>, vector<8x32xbf16>, vector<2x8x32xf32> -> vector<2x8x32xf32>
    "tpu.trace_stop"() : () -> ()
    %277 = arith.addf %254, %276 : vector<2x8x32xf32>
    %278 = vector.shape_cast %277 : vector<2x8x32xf32> to vector<16x32xf32>
    %c1_95 = arith.constant 1 : index
    %c0_96 = arith.constant 0 : index
    %c0_97 = arith.constant 0 : index
    %279 = vector.load %arg3[%c1_95, %c0_96, %c0_97] : memref<2x1x32xf32, #tpu.memory_space<vmem>>, vector<1x1x32xf32>
    %280 = vector.shape_cast %279 : vector<1x1x32xf32> to vector<1x32xf32>
    %281 = vector.broadcast %280 : vector<1x32xf32> to vector<16x32xf32>
    %282 = arith.addf %278, %281 : vector<16x32xf32>
    %283 = arith.addf %282, %177 : vector<16x32xf32>
    %cst_98 = arith.constant dense<0.000000e+00> : vector<16xf32>
    %284 = vector.multi_reduction <add>, %283, %cst_98 [1] : vector<16x32xf32> to vector<16xf32>
    %285 = vector.shape_cast %284 : vector<16xf32> to vector<16x1xf32>
    %cst_99 = arith.constant 3.200000e+01 : f32
    %286 = vector.broadcast %cst_99 : f32 to vector<16x1xf32>
    %287 = arith.divf %285, %286 : vector<16x1xf32>
    %288 = vector.broadcast %287 : vector<16x1xf32> to vector<16x32xf32>
    %289 = arith.subf %283, %288 : vector<16x32xf32>
    %290 = arith.mulf %289, %289 : vector<16x32xf32>
    %cst_100 = arith.constant dense<0.000000e+00> : vector<16xf32>
    %291 = vector.multi_reduction <add>, %290, %cst_100 [1] : vector<16x32xf32> to vector<16xf32>
    %292 = vector.shape_cast %291 : vector<16xf32> to vector<16x1xf32>
    %cst_101 = arith.constant 3.200000e+01 : f32
    %293 = vector.broadcast %cst_101 : f32 to vector<16x1xf32>
    %294 = arith.divf %292, %293 : vector<16x1xf32>
    %295 = vector.broadcast %287 : vector<16x1xf32> to vector<16x32xf32>
    %296 = arith.subf %283, %295 : vector<16x32xf32>
    %cst_102 = arith.constant 9.99999974E-6 : f32
    %297 = vector.broadcast %cst_102 : f32 to vector<16x1xf32>
    %298 = arith.addf %294, %297 : vector<16x1xf32>
    %299 = math.rsqrt %298 : vector<16x1xf32>
    %300 = vector.broadcast %299 : vector<16x1xf32> to vector<16x32xf32>
    %301 = arith.mulf %296, %300 : vector<16x32xf32>
    %c1_103 = arith.constant 1 : index
    %c0_104 = arith.constant 0 : index
    %c0_105 = arith.constant 0 : index
    %302 = vector.load %arg4[%c1_103, %c0_104, %c0_105] : memref<2x1x32xf32, #tpu.memory_space<vmem>>, vector<1x1x32xf32>
    %303 = vector.shape_cast %302 : vector<1x1x32xf32> to vector<1x32xf32>
    %304 = vector.broadcast %303 : vector<1x32xf32> to vector<16x32xf32>
    %305 = arith.mulf %301, %304 : vector<16x32xf32>
    %c1_106 = arith.constant 1 : index
    %c0_107 = arith.constant 0 : index
    %c0_108 = arith.constant 0 : index
    %306 = vector.load %arg5[%c1_106, %c0_107, %c0_108] : memref<2x1x32xf32, #tpu.memory_space<vmem>>, vector<1x1x32xf32>
    %307 = vector.shape_cast %306 : vector<1x1x32xf32> to vector<1x32xf32>
    %308 = vector.broadcast %307 : vector<1x32xf32> to vector<16x32xf32>
    %309 = arith.addf %305, %308 : vector<16x32xf32>
    %310 = arith.truncf %309 : vector<16x32xf32> to vector<16x32xbf16>
    %c1_109 = arith.constant 1 : index
    %c0_110 = arith.constant 0 : index
    %c0_111 = arith.constant 0 : index
    %311 = vector.load %arg6[%c1_109, %c0_110, %c0_111] : memref<2x32x128xbf16, #tpu.memory_space<vmem>>, vector<1x32x128xbf16>
    %312 = vector.shape_cast %311 : vector<1x32x128xbf16> to vector<32x128xbf16>
    %cst_112 = arith.constant dense<0.000000e+00> : vector<16x128xf32>
    %313 = tpu.matmul %310, %312, %cst_112 {dimension_numbers = #tpu.dot_dimension_numbers<[1], [0], [0], [1], [0, 0, 1, 1], [], []>} : vector<16x32xbf16>, vector<32x128xbf16>, vector<16x128xf32> -> vector<16x128xf32>
    %c1_113 = arith.constant 1 : index
    %c0_114 = arith.constant 0 : index
    %c0_115 = arith.constant 0 : index
    %314 = vector.load %arg7[%c1_113, %c0_114, %c0_115] : memref<2x1x128xf32, #tpu.memory_space<vmem>>, vector<1x1x128xf32>
    %315 = vector.shape_cast %314 : vector<1x1x128xf32> to vector<1x128xf32>
    %316 = vector.broadcast %315 : vector<1x128xf32> to vector<16x128xf32>
    %317 = arith.addf %313, %316 : vector<16x128xf32>
    %cst_116 = arith.constant 0.000000e+00 : f32
    %318 = vector.broadcast %cst_116 : f32 to vector<16x128xf32>
    %319 = arith.maximumf %317, %318 : vector<16x128xf32>
    %320 = arith.truncf %319 : vector<16x128xf32> to vector<16x128xbf16>
    %c1_117 = arith.constant 1 : index
    %c0_118 = arith.constant 0 : index
    %c0_119 = arith.constant 0 : index
    %321 = vector.load %arg8[%c1_117, %c0_118, %c0_119] : memref<2x128x32xbf16, #tpu.memory_space<vmem>>, vector<1x128x32xbf16>
    %322 = vector.shape_cast %321 : vector<1x128x32xbf16> to vector<128x32xbf16>
    %cst_120 = arith.constant dense<0.000000e+00> : vector<16x32xf32>
    %323 = tpu.matmul %320, %322, %cst_120 {dimension_numbers = #tpu.dot_dimension_numbers<[1], [0], [0], [1], [0, 0, 1, 1], [], []>} : vector<16x128xbf16>, vector<128x32xbf16>, vector<16x32xf32> -> vector<16x32xf32>
    %c1_121 = arith.constant 1 : index
    %c0_122 = arith.constant 0 : index
    %c0_123 = arith.constant 0 : index
    %324 = vector.load %arg9[%c1_121, %c0_122, %c0_123] : memref<2x1x32xf32, #tpu.memory_space<vmem>>, vector<1x1x32xf32>
    %325 = vector.shape_cast %324 : vector<1x1x32xf32> to vector<1x32xf32>
    %326 = vector.broadcast %325 : vector<1x32xf32> to vector<16x32xf32>
    %327 = arith.addf %323, %326 : vector<16x32xf32>
    %328 = arith.addf %327, %309 : vector<16x32xf32>
    %cst_124 = arith.constant dense<0.000000e+00> : vector<16xf32>
    %329 = vector.multi_reduction <add>, %328, %cst_124 [1] : vector<16x32xf32> to vector<16xf32>
    %330 = vector.shape_cast %329 : vector<16xf32> to vector<16x1xf32>
    %cst_125 = arith.constant 3.200000e+01 : f32
    %331 = vector.broadcast %cst_125 : f32 to vector<16x1xf32>
    %332 = arith.divf %330, %331 : vector<16x1xf32>
    %333 = vector.broadcast %332 : vector<16x1xf32> to vector<16x32xf32>
    %334 = arith.subf %328, %333 : vector<16x32xf32>
    %335 = arith.mulf %334, %334 : vector<16x32xf32>
    %cst_126 = arith.constant dense<0.000000e+00> : vector<16xf32>
    %336 = vector.multi_reduction <add>, %335, %cst_126 [1] : vector<16x32xf32> to vector<16xf32>
    %337 = vector.shape_cast %336 : vector<16xf32> to vector<16x1xf32>
    %cst_127 = arith.constant 3.200000e+01 : f32
    %338 = vector.broadcast %cst_127 : f32 to vector<16x1xf32>
    %339 = arith.divf %337, %338 : vector<16x1xf32>
    %340 = vector.broadcast %332 : vector<16x1xf32> to vector<16x32xf32>
    %341 = arith.subf %328, %340 : vector<16x32xf32>
    %cst_128 = arith.constant 9.99999974E-6 : f32
    %342 = vector.broadcast %cst_128 : f32 to vector<16x1xf32>
    %343 = arith.addf %339, %342 : vector<16x1xf32>
    %344 = math.rsqrt %343 : vector<16x1xf32>
    %345 = vector.broadcast %344 : vector<16x1xf32> to vector<16x32xf32>
    %346 = arith.mulf %341, %345 : vector<16x32xf32>
    %c1_129 = arith.constant 1 : index
    %c0_130 = arith.constant 0 : index
    %c0_131 = arith.constant 0 : index
    %347 = vector.load %arg10[%c1_129, %c0_130, %c0_131] : memref<2x1x32xf32, #tpu.memory_space<vmem>>, vector<1x1x32xf32>
    %348 = vector.shape_cast %347 : vector<1x1x32xf32> to vector<1x32xf32>
    %349 = vector.broadcast %348 : vector<1x32xf32> to vector<16x32xf32>
    %350 = arith.mulf %346, %349 : vector<16x32xf32>
    %c1_132 = arith.constant 1 : index
    %c0_133 = arith.constant 0 : index
    %c0_134 = arith.constant 0 : index
    %351 = vector.load %arg11[%c1_132, %c0_133, %c0_134] : memref<2x1x32xf32, #tpu.memory_space<vmem>>, vector<1x1x32xf32>
    %352 = vector.shape_cast %351 : vector<1x1x32xf32> to vector<1x32xf32>
    %353 = vector.broadcast %352 : vector<1x32xf32> to vector<16x32xf32>
    %354 = arith.addf %350, %353 : vector<16x32xf32>
    %c0_135 = arith.constant 0 : index
    %c0_136 = arith.constant 0 : index
    %355 = vector.load %arg12[%c0_135, %c0_136] : memref<16x32xf32, #tpu.memory_space<vmem>>, vector<16x32xf32>
    tpu.vector_store %arg12[%c0_135, %c0_136], %354 {strides = array<i32>} : memref<16x32xf32, #tpu.memory_space<vmem>>, vector<16x32xf32>,
    return
  }
}

</mosaic_0001>

<bundles_post_ra>
// kernel: tpu_custom_call.1
= control target key start
LH: loop header
LB: loop body
LE: loop exit
PB: predicated region body
PF: predicated region fallthrough
CT: control target
= control target key end

     0   :  { %v3675_v1 = vmov 0.0   ;;  %vm3676_vm0 = vmmov 0   ;;  %vm62_vm1 = vcmask 261120   ;;  %s4348_s0 = inlined_call_operand.vmem [shape: f32[16,32], index: 0, kind: input, shape index: {}]   ;;  %s4349_s1 = inlined_call_operand.vmem [shape: bf16[2,32,96], index: 1, kind: input, shape index: {}]   ;;  %s4350_s2 = inlined_call_operand.vmem [shape: bf16[2,32,32], index: 2, kind: input, shape index: {}]   ;;  %s4351_s3 = inlined_call_operand.vmem [shape: f32[2,1,32], index: 3, kind: input, shape index: {}]   ;;  %s4352_s4 = inlined_call_operand.vmem [shape: f32[2,1,32], index: 4, kind: input, shape index: {}]   ;;  %s4353_s5 = inlined_call_operand.vmem [shape: f32[2,1,32], index: 5, kind: input, shape index: {}]   ;;  %s4354_s6 = inlined_call_operand.vmem [shape: bf16[2,32,128], index: 6, kind: input, shape index: {}]   ;;  %s4355_s7 = inlined_call_operand.vmem [shape: f32[2,1,128], index: 7, kind: input, shape index: {}]   ;;  %s4356_s8 = inlined_call_operand.vmem [shape: bf16[2,128,32], index: 8, kind: input, shape index: {}]   ;;  %s4357_s9 = inlined_call_operand.vmem [shape: f32[2,1,32], index: 9, kind: input, shape index: {}]   ;;  %s4358_s10 = inlined_call_operand.vmem [shape: f32[2,1,32], index: 10, kind: input, shape index: {}]   ;;  %s4359_s11 = inlined_call_operand.vmem [shape: f32[2,1,32], index: 11, kind: input, shape index: {}]   ;;  %s4360_s12 = inlined_call_operand.hbm [shape: f32[16,32], index: 12, kind: output, shape index: {}]  }
   0x1   :  { %v3547_v0 = vld [vmem:[%s4349_s1] sm:$0xff]   ;;  %3219 = vmatprep.subr.bf16.mxu1 %v3675_v1  ;;  %v3548_v2 = vld [vmem:[%s4349_s1 + $0x8] sm:$0xff]   ;;  %3245 = vmatprep.subr.bf16.mxu0 %v3675_v1 }
   0x2   :  { %3220 = vmatpush3.bf16.msra.mxu1 %v3547_v0  ;;  %3223 = vmatprep.mubr.msk.bf16.mxu1 %vm3676_vm0, %v3675_v1  ;;  %v3769_v3 = vld [vmem:[%s4348_s0] sm:$0xff]  ;;  %v3774_v4 = vld [vmem:[%s4348_s0 + $0x8] sm:$0xff] }
   0x3   :  { %3221 = vmatprep.subr.bf16.mxu1 %v3675_v1  ;;  %3247 = vmatprep.mubr.msk.bf16.mxu0 %vm3676_vm0, %v3675_v1  ;;  %v45_v5 = vpack.c.bf16 %v3774_v4, %v3769_v3 }
   0x6   :  { %3222 = vmatpush3.bf16.msra.mxu1 %v3548_v2 }
   0x7   :  { %3227 = vmatprep.subr.bf16.mxu1 %v3675_v1 }
   0x9   :  { %3224 = vmatmul.mubr.msk.bf16.vlgmr.msra.gmra.mrb[0].mxu1 %vm62_vm1, %v45_v5 }
   0xa   :  { %3229 = vmatprep.mubr.msk.bf16.mxu1 %vm3676_vm0, %v3675_v1 }
   0xb   :  { %17 = vsyncpa [#allocation3], 0  ;;  %s3677_s0 = smov 96   ;;  %vm116_vm2 = vcmask 64512   ;;  %s3678_s29 = smov 64   ;;  %vm241_vm3 = vcmask 1043456  }
   0xc   :  { %s3679_s30 = smov 88   ;;  %s3680_s13 = smov 120  }
   0xd   :  { %s3681_s14 = smov 56   ;;  %s3682_s15 = smov 112  }
   0xe   :  { %s3683_s16 = smov 80   ;;  %s3684_s21 = smov 48  }
   0xf   :  { %s3685_s22 = smov 72   ;;  %s3686_s23 = smov 104  }
  0x10   :  { %s3687_s26 = smov 40   ;;  %s3688_s27 = smov [#allocation2]  }
  0x11   :  { %s2965_s28 = sshll.u32 %s3688_s27, 4  ;;  %s2966_s28 = int_to_ptr.vmem [resolvable:$true] %s2965_s28 }
  0x12   :  { %s3651_s17 = scalar_lea.vmem %s2966_s28, 256  ;;  %p3656_p1 = scmp.lt.s32.totalorder %s2966_s28, %s2966_s28 }
  0x13   :  { %p3652_p0 = scmp.ne.s32.totalorder %s2966_s28, %s3651_s17  ;;  %p3657_p2 = scmp.lt.s32.totalorder %s3651_s17, %s3651_s17 }
  0x15   :  { %p3658_p3 = por %p3657_p2, %p3656_p1 }
  0x17   :  { %p3659_p4 = pnand %p3658_p3, %p3652_p0 }
  0xdc   :  { %v100_v6 = vpop.f32.mrb[0].mxu1 }
  0xdd   :  { %v3785_v7 = vpack.c.bf16 %v100_v6, %v100_v6  ;;  %v3225_v8 = vpop.f32.mrb[1].mxu1 }
  0xde   :  { %v103_v9 = vpop.f32.mrb[2].mxu1 }
  0xdf   :  { %114 = vrot.lane.b32.xlu0 %v3785_v7, %s3677_s0  ;;  %v3226_v10 = vpop.f32.mrb[3].mxu1  ;;  %v3789_v11 = vpack.c.bf16 %v103_v9, %v103_v9 }
  0xe3   :  { %164 = vrot.lane.b32.xlu0 %v3789_v11, %s3677_s0 }
 0x151   :  { %v115_v12 = vpop.permute.xlu0 %114 }
 0x152   :  { %v121_v13 = vsel %vm116_vm2, %v115_v12, 0 }
 0x153   :  { %3228 = vmatpush3.bf16.xpose.msra.mxu1 %v121_v13 }
 0x154   :  { %3233 = vmatprep.subr.bf16.mxu1 %v3675_v1 }
 0x155   :  { %v165_v14 = vpop.permute.xlu0 %164 }
 0x156   :  { %v170_v15 = vsel %vm116_vm2, %v165_v14, 0 }
 0x15a   :  { %3230 = vmatmul.mubr.msk.bf16.vlgmr.msra.gmra.mrb[4].mxu1 %vm116_vm2, %v3785_v7 }
 0x15b   :  { %3234 = vmatpush3.bf16.xpose.msra.mxu1 %v170_v15  ;;  %3235 = vmatprep.mubr.msk.bf16.mxu1 %vm3676_vm0, %v3675_v1 }
 0x15c   :  { %3239 = vmatprep.subr.bf16.mxu1 %v3675_v1 }
 0x162   :  { %3236 = vmatmul.mubr.msk.bf16.vlgmr.msra.gmra.mrb[8].mxu1 %vm116_vm2, %v3789_v11 }
 0x163   :  { %3241 = vmatprep.mubr.msk.bf16.mxu1 %vm3676_vm0, %v3675_v1 }
 0x22d   :  { %v157_v16 = vpop.f32.mrb[4].mxu1 }
 0x22e   :  { %v3231_v17 = vpop.f32.mrb[5].mxu1  ;;  %v212_v18 = vsel %vm116_vm2, %v157_v16, -inf }
 0x22f   :  { %213 = vmax.xlane.f32.xlu1 %v212_v18  ;;  %v160_v19 = vpop.f32.mrb[6].mxu1 }
 0x230   :  { %v3232_v20 = vpop.f32.mrb[7].mxu1 }
 0x235   :  { %v206_v21 = vpop.f32.mrb[8].mxu1 }
 0x236   :  { %v3237_v22 = vpop.f32.mrb[9].mxu1  ;;  %v215_v23 = vsel %vm116_vm2, %v206_v21, -inf }
 0x237   :  { %216 = vmax.xlane.f32.xlu1 %v215_v23  ;;  %v209_v24 = vpop.f32.mrb[10].mxu1 }
 0x238   :  { %v3238_v25 = vpop.f32.mrb[11].mxu1 }
 0x248   :  { %236 = vrot.lane.b32.xlu1 %v3785_v7, %s3678_s29 }
 0x24c   :  { %285 = vrot.lane.b32.xlu1 %v3789_v11, %s3678_s29 }
 0x250   :  { %337 = vrot.lane.b32.xlu1 %v3785_v7, %s3679_s30 }
 0x2bc   :  { %v214_v26 = vpop.xlane.xlu1 %213 }
 0x2bd   :  { %v218_v27 = vsub.f32 %v157_v16, %v214_v26 }
 0x2bf   :  { %v220_v28 = vmul.f32 1.442695, %v218_v27 }
 0x2c1   :  { %3571 = vpow2.f32 %v220_v28 }
 0x2c4   :  { %v217_v29 = vpop.xlane.xlu1 %216 }
 0x2c5   :  { %v219_v30 = vsub.f32 %v206_v21, %v217_v29 }
 0x2c7   :  { %v222_v31 = vmul.f32 1.442695, %v219_v30 }
 0x2c8   :  { %v237_v32 = vpop.permute.xlu1 %236 }
 0x2c9   :  { %3573 = vpow2.f32 %v222_v31  ;;  %v243_v33 = vsel %vm241_vm3, %v237_v32, 0 }
 0x2ca   :  { %3240 = vmatpush3.bf16.msra.mxu1 %v243_v33 }
 0x2cb   :  { %v3572_v34 = vpop.eup %3571  ;;  %3251 = vmatprep.subr.bf16.mxu1 %v3675_v1 }
 0x2cc   :  { %v286_v35 = vpop.permute.xlu1 %285  ;;  %v224_v36 = vsel %vm116_vm2, %v3572_v34, 0.0 }
 0x2cd   :  { %225 = vadd.xlane.f32.xlu0 %v224_v36  ;;  %v291_v37 = vsel %vm241_vm3, %v286_v35, 0 }
 0x2ce   :  { %3246 = vmatpush3.bf16.msra.mxu0 %v291_v37 }
 0x2cf   :  { %3257 = vmatprep.subr.bf16.mxu0 %v3675_v1 }
 0x2d0   :  { %v338_v41 = vpop.permute.xlu1 %337 }
 0x2d1   :  { %v343_v46 = vsel %vm116_vm2, %v338_v41, 0 }
 0x2d3   :  { %v3574_v38 = vpop.eup %3573 }
 0x2d4   :  { %v227_v39 = vsel %vm116_vm2, %v3574_v38, 0.0 }
 0x2d5   :  { %228 = vadd.xlane.f32.xlu1 %v227_v39 }
 0x2e3   :  { %335 = vrot.lane.b32.xlu0 %v3785_v7, %s3680_s13 }
 0x2e6   :  { %387 = vrot.lane.b32.xlu1 %v3789_v11, %s3679_s30 }
 0x2ea   :  { %385 = vrot.lane.b32.xlu1 %v3789_v11, %s3680_s13 }
 0x35a   :  { %v226_v40 = vpop.xlane.xlu0 %225 }
 0x35b   :  { %3575 = vrcp.f32 %v226_v40 }
 0x35e   :  { %v336_v51 = vpop.permute.xlu0 %335 }
 0x362   :  { %v229_v42 = vpop.xlane.xlu1 %228 }
 0x363   :  { %3577 = vrcp.f32 %v229_v42  ;;  %v108_v42 = vld [vmem:[%s4350_s2 + $0x4] sm:$0xf] }
 0x365   :  { %v3576_v43 = vpop.eup %3575 }
 0x366   :  { %v232_v44 = vmul.f32 %v3576_v43, %v3572_v34  ;;  %v388_v49 = vpop.permute.xlu1 %387  ;;  %v107_v34 = vld [vmem:[%s4350_s2] sm:$0xf]  ;;  %v566_v43 = vsel %vm241_vm3, %v108_v42, 0 }
 0x367   :  { %v393_v52 = vsel %vm116_vm2, %v388_v49, 0  ;;  %v618_v37 = vsel %vm241_vm3, %v107_v34, 0 }
 0x368   :  { %v234_v45 = vpack.c.bf16 %v232_v44, %v232_v44 }
 0x36a   :  { %3242 = vmatmul.mubr.msk.bf16.vlgmr.msra.gmra.mrb[12].mxu1 %vm116_vm2, %v234_v45  ;;  %v386_v53 = vpop.permute.xlu1 %385 }
 0x36b   :  { %3252 = vmatpush3.bf16.xpose.msra.mxu1 %v343_v46  ;;  %3253 = vmatprep.mubr.msk.bf16.mxu1 %vm3676_vm0, %v3675_v1 }
 0x36c   :  { %3263 = vmatprep.subr.bf16.mxu1 %v3675_v1 }
 0x36d   :  { %v3578_v47 = vpop.eup %3577 }
 0x36e   :  { %v233_v48 = vmul.f32 %v3578_v47, %v3574_v38 }
 0x370   :  { %v235_v50 = vpack.c.bf16 %v233_v48, %v233_v48 }
 0x372   :  { %3248 = vmatmul.mubr.msk.bf16.vlgmr.msra.gmra.mrb[0].mxu0 %vm116_vm2, %v235_v50  ;;  %3254 = vmatmul.mubr.msk.bf16.vlgmr.msra.gmra.mrb[16].mxu1 %vm116_vm2, %v336_v51 }
 0x373   :  { %3258 = vmatpush3.bf16.xpose.msra.mxu0 %v393_v52  ;;  %3259 = vmatprep.mubr.msk.bf16.mxu0 %vm3676_vm0, %v3675_v1 }
 0x374   :  { %3269 = vmatprep.subr.bf16.mxu0 %v3675_v1  ;;  %3265 = vmatprep.mubr.msk.bf16.mxu1 %vm3676_vm0, %v3675_v1 }
 0x37a   :  { %3260 = vmatmul.mubr.msk.bf16.vlgmr.msra.gmra.mrb[4].mxu0 %vm116_vm2, %v386_v53 }
 0x37b   :  { %3271 = vmatprep.mubr.msk.bf16.mxu0 %vm3676_vm0, %v3675_v1 }
 0x43d   :  { %v3841_v54 = vpop.f32.mrb[12].mxu1 }
 0x43e   :  { %v3243_v55 = vpop.f32.mrb[13].mxu1 }
 0x43f   :  { %v282_v56 = vpop.f32.mrb[14].mxu1 }
 0x440   :  { %v3244_v57 = vpop.f32.mrb[15].mxu1 }
 0x445   :  { %v3843_v58 = vpop.f32.mrb[0].mxu0  ;;  %v379_v59 = vpop.f32.mrb[16].mxu1 }
 0x446   :  { %v3102_v60 = vpack.c.bf16 %v3843_v58, %v3841_v54  ;;  %v3249_v61 = vpop.f32.mrb[1].mxu0  ;;  %v3255_v62 = vpop.f32.mrb[17].mxu1  ;;  %v435_v63 = vsel %vm116_vm2, %v379_v59, -inf }
 0x447   :  { %v330_v0 = vpop.f32.mrb[2].mxu0  ;;  %436 = vmax.xlane.f32.xlu1 %v435_v63  ;;  %v382_v2 = vpop.f32.mrb[18].mxu1 }
 0x448   :  { %v3250_v5 = vpop.f32.mrb[3].mxu0  ;;  %v3256_v6 = vpop.f32.mrb[19].mxu1 }
 0x44d   :  { %v429_v8 = vpop.f32.mrb[4].mxu0 }
 0x44e   :  { %v3261_v9 = vpop.f32.mrb[5].mxu0  ;;  %v438_v10 = vsel %vm116_vm2, %v429_v8, -inf }
 0x44f   :  { %439 = vmax.xlane.f32.xlu0 %v438_v10  ;;  %v432_v12 = vpop.f32.mrb[6].mxu0 }
 0x450   :  { %v3262_v13 = vpop.f32.mrb[7].mxu0 }
 0x465   :  { %507 = vrot.lane.b32.xlu0 %v3789_v11, %s3681_s14 }
 0x469   :  { %661 = vrot.lane.b32.xlu0 %v3785_v7, %s3682_s15 }
 0x4d4   :  { %v437_v14 = vpop.xlane.xlu1 %436 }
 0x4d5   :  { %v441_v15 = vsub.f32 %v379_v59, %v437_v14 }
 0x4d7   :  { %v443_v16 = vmul.f32 1.442695, %v441_v15 }
 0x4d9   :  { %3579 = vpow2.f32 %v443_v16 }
 0x4dc   :  { %v440_v17 = vpop.xlane.xlu0 %439 }
 0x4dd   :  { %v442_v18 = vsub.f32 %v429_v8, %v440_v17 }
 0x4df   :  { %v445_v19 = vmul.f32 1.442695, %v442_v18 }
 0x4e0   :  { %v508_v20 = vpop.permute.xlu0 %507 }
 0x4e1   :  { %3581 = vpow2.f32 %v445_v19  ;;  %v513_v21 = vsel %vm241_vm3, %v508_v20, 0 }
 0x4e2   :  { %3270 = vmatpush3.bf16.msra.mxu0 %v513_v21 }
 0x4e3   :  { %v3580_v22 = vpop.eup %3579  ;;  %3281 = vmatprep.subr.bf16.mxu0 %v3675_v1 }
 0x4e4   :  { %v447_v23 = vsel %vm116_vm2, %v3580_v22, 0.0  ;;  %v662_v56 = vpop.permute.xlu0 %661 }
 0x4e5   :  { %448 = vadd.xlane.f32.xlu1 %v447_v23 }
 0x4eb   :  { %v3582_v24 = vpop.eup %3581 }
 0x4ec   :  { %v450_v25 = vsel %vm116_vm2, %v3582_v24, 0.0 }
 0x4ed   :  { %451 = vadd.xlane.f32.xlu1 %v450_v25 }
 0x4fe   :  { %459 = vrot.lane.b32.xlu1 %v3785_v7, %s3681_s14 }
 0x502   :  { %663 = vrot.lane.b32.xlu1 %v3785_v7, %s3683_s16 }
 0x506   :  { %713 = vrot.lane.b32.xlu1 %v3789_v11, %s3683_s16 }
 0x50a   :  { %711 = vrot.lane.b32.xlu1 %v3789_v11, %s3682_s15 }
 0x572   :  { %v449_v26 = vpop.xlane.xlu1 %448 }
 0x573   :  { %3583 = vrcp.f32 %v449_v26 }
 0x57a   :  { %v452_v27 = vpop.xlane.xlu1 %451 }
 0x57b   :  { %3585 = vrcp.f32 %v452_v27 }
 0x57d   :  { %v3584_v28 = vpop.eup %3583 }
 0x57e   :  { %v455_v29 = vmul.f32 %v3584_v28, %v3580_v22  ;;  %v460_v30 = vpop.permute.xlu1 %459 }
 0x57f   :  { %v465_v31 = vsel %vm241_vm3, %v460_v30, 0 }
 0x580   :  { %3264 = vmatpush3.bf16.msra.mxu1 %v465_v31  ;;  %v457_v32 = vpack.c.bf16 %v455_v29, %v455_v29 }
 0x581   :  { %3275 = vmatprep.subr.bf16.mxu1 %v3675_v1 }
 0x582   :  { %v664_v38 = vpop.permute.xlu1 %663 }
 0x583   :  { %3266 = vmatmul.mubr.msk.bf16.vlgmr.msra.gmra.mrb[20].mxu1 %vm116_vm2, %v457_v32  ;;  %v669_v52 = vsel %vm116_vm2, %v664_v38, 0 }
 0x584   :  { %3277 = vmatprep.mubr.msk.bf16.mxu1 %vm3676_vm0, %v3675_v1  ;;  %3276 = vmatpush3.bf16.msra.mxu1 %v566_v43 }
 0x585   :  { %v3586_v33 = vpop.eup %3585  ;;  %3287 = vmatprep.subr.bf16.mxu1 %v3675_v1 }
 0x586   :  { %v456_v35 = vmul.f32 %v3586_v33, %v3582_v24  ;;  %v714_v39 = vpop.permute.xlu1 %713 }
 0x587   :  { %v719_v40 = vsel %vm116_vm2, %v714_v39, 0 }
 0x588   :  { %v458_v36 = vpack.c.bf16 %v456_v35, %v456_v35 }
 0x58a   :  { %3272 = vmatmul.mubr.msk.bf16.vlgmr.msra.gmra.mrb[8].mxu0 %vm116_vm2, %v458_v36  ;;  %v712_v41 = vpop.permute.xlu1 %711 }
 0x58b   :  { %3282 = vmatpush3.bf16.msra.mxu0 %v618_v37  ;;  %3283 = vmatprep.mubr.msk.bf16.mxu0 %vm3676_vm0, %v3675_v1 }
 0x58c   :  { %3293 = vmatprep.subr.bf16.mxu0 %v3675_v1 }
 0x592   :  { %3284 = vmatmul.mubr.msk.bf16.vlgmr.msra.gmra.mrb[12].mxu0 %vm116_vm2, %v3102_v60 }
 0x593   :  { %3295 = vmatprep.mubr.msk.bf16.mxu0 %vm3676_vm0, %v3675_v1 }
 0x594   :  { %3294 = vmatpush3.bf16.xpose.msra.mxu0 %v719_v40 }
 0x595   :  { %3305 = vmatprep.subr.bf16.mxu0 %v3675_v1 }
 0x59b   :  { %3296 = vmatmul.mubr.msk.bf16.vlgmr.msra.gmra.mrb[16].mxu0 %vm116_vm2, %v712_v41  ;;  %v109_v41 = vld [vmem:[%s4350_s2 + $0x8] sm:$0xf] }
 0x59c   :  { %3307 = vmatprep.mubr.msk.bf16.mxu0 %vm3676_vm0, %v3675_v1  ;;  %v892_v42 = vsel %vm241_vm3, %v109_v41, 0 }
 0x656   :  { %v501_v44 = vpop.f32.mrb[20].mxu1 }
 0x657   :  { %v3267_v45 = vpop.f32.mrb[21].mxu1 }
 0x658   :  { %v504_v46 = vpop.f32.mrb[22].mxu1 }
 0x659   :  { %v3268_v47 = vpop.f32.mrb[23].mxu1 }
 0x65d   :  { %v549_v48 = vpop.f32.mrb[8].mxu0 }
 0x65e   :  { %v3101_v49 = vpack.c.bf16 %v549_v48, %v501_v44  ;;  %v3273_v50 = vpop.f32.mrb[9].mxu0 }
 0x65f   :  { %v552_v51 = vpop.f32.mrb[10].mxu0 }
 0x660   :  { %v3274_v53 = vpop.f32.mrb[11].mxu0  ;;  %3278 = vmatmul.mubr.msk.bf16.vlgmr.msra.gmra.mrb[24].mxu1 %vm116_vm2, %v3101_v49 }
 0x661   :  { %3288 = vmatpush3.bf16.xpose.msra.mxu1 %v669_v52  ;;  %3289 = vmatprep.mubr.msk.bf16.mxu1 %vm3676_vm0, %v3675_v1 }
 0x662   :  { %3299 = vmatprep.subr.bf16.mxu1 %v3675_v1 }
 0x665   :  { %v654_v54 = vpop.f32.mrb[12].mxu0 }
 0x666   :  { %v3285_v55 = vpop.f32.mrb[13].mxu0 }
 0x667   :  { %v657_v57 = vpop.f32.mrb[14].mxu0 }
 0x668   :  { %v3286_v58 = vpop.f32.mrb[15].mxu0  ;;  %3290 = vmatmul.mubr.msk.bf16.vlgmr.msra.gmra.mrb[28].mxu1 %vm116_vm2, %v662_v56 }
 0x669   :  { %3301 = vmatprep.mubr.msk.bf16.mxu1 %vm3676_vm0, %v3675_v1 }
 0x66e   :  { %v755_v59 = vpop.f32.mrb[16].mxu0 }
 0x66f   :  { %v3297_v60 = vpop.f32.mrb[17].mxu0  ;;  %v764_v61 = vsel %vm116_vm2, %v755_v59, -inf }
 0x670   :  { %765 = vmax.xlane.f32.xlu1 %v764_v61  ;;  %v758_v62 = vpop.f32.mrb[18].mxu0 }
 0x671   :  { %v3298_v63 = vpop.f32.mrb[19].mxu0 }
 0x681   :  { %785 = vrot.lane.b32.xlu1 %v3785_v7, %s3684_s21 }
 0x685   :  { %939 = vrot.lane.b32.xlu1 %v3785_v7, %s3685_s22 }
 0x689   :  { %989 = vrot.lane.b32.xlu1 %v3789_v11, %s3685_s22 }
 0x68d   :  { %987 = vrot.lane.b32.xlu1 %v3789_v11, %s3686_s23 }
 0x6fd   :  { %v766_v0 = vpop.xlane.xlu1 %765 }
 0x6fe   :  { %v768_v6 = vsub.f32 %v755_v59, %v766_v0 }
 0x700   :  { %v771_v8 = vmul.f32 1.442695, %v768_v6 }
 0x701   :  { %v786_v2 = vpop.permute.xlu1 %785 }
 0x702   :  { %v791_v5 = vsel %vm241_vm3, %v786_v2, 0  ;;  %3587 = vpow2.f32 %v771_v8 }
 0x703   :  { %3300 = vmatpush3.bf16.msra.mxu1 %v791_v5 }
 0x704   :  { %3311 = vmatprep.subr.bf16.mxu1 %v3675_v1 }
 0x705   :  { %v940_v36 = vpop.permute.xlu1 %939 }
 0x706   :  { %v945_v38 = vsel %vm116_vm2, %v940_v36, 0 }
 0x709   :  { %v990_v47 = vpop.permute.xlu1 %989 }
 0x70a   :  { %v995_v52 = vsel %vm116_vm2, %v990_v47, 0 }
 0x70c   :  { %v3588_v19 = vpop.eup %3587 }
 0x70d   :  { %v776_v22 = vsel %vm116_vm2, %v3588_v19, 0.0  ;;  %v988_v59 = vpop.permute.xlu1 %987 }
 0x733   :  { %v602_v9 = vpop.f32.mrb[24].mxu1 }
 0x734   :  { %v3913_v10 = vadd.f32 %v654_v54, %v602_v9  ;;  %v3279_v12 = vpop.f32.mrb[25].mxu1 }
 0x735   :  { %v605_v13 = vpop.f32.mrb[26].mxu1 }
 0x736   :  { %v3915_v14 = vadd.f32 %v657_v57, %v605_v13  ;;  %v3280_v15 = vpop.f32.mrb[27].mxu1 }
 0x73b   :  { %v705_v16 = vpop.f32.mrb[28].mxu1 }
 0x73c   :  { %v3291_v17 = vpop.f32.mrb[29].mxu1  ;;  %v761_v18 = vsel %vm116_vm2, %v705_v16, -inf }
 0x73d   :  { %762 = vmax.xlane.f32.xlu0 %v761_v18  ;;  %v708_v20 = vpop.f32.mrb[30].mxu1 }
 0x73e   :  { %v3292_v21 = vpop.f32.mrb[31].mxu1 }
 0x741   :  { %777 = vadd.xlane.f32.xlu0 %v776_v22 }
 0x7ca   :  { %v763_v23 = vpop.xlane.xlu0 %762 }
 0x7cb   :  { %v767_v24 = vsub.f32 %v705_v16, %v763_v23 }
 0x7cd   :  { %v769_v25 = vmul.f32 1.442695, %v767_v24 }
 0x7ce   :  { %v778_v28 = vpop.xlane.xlu0 %777 }
 0x7cf   :  { %3589 = vpow2.f32 %v769_v25 }
 0x7d0   :  { %3591 = vrcp.f32 %v778_v28 }
 0x7d9   :  { %v3590_v26 = vpop.eup %3589 }
 0x7da   :  { %v773_v27 = vsel %vm116_vm2, %v3590_v26, 0.0  ;;  %v3592_v29 = vpop.eup %3591 }
 0x7db   :  { %774 = vadd.xlane.f32.xlu0 %v773_v27  ;;  %v782_v31 = vmul.f32 %v3592_v29, %v3588_v19  ;;  %v110_v27 = vld [vmem:[%s4350_s2 + $0xc] sm:$0xf] }
 0x7dc   :  { %v1168_v28 = vsel %vm241_vm3, %v110_v27, 0 }
 0x7dd   :  { %v784_v34 = vpack.c.bf16 %v782_v31, %v782_v31 }
 0x7f1   :  { %833 = vrot.lane.b32.xlu0 %v3789_v11, %s3684_s21 }
 0x7f5   :  { %937 = vrot.lane.b32.xlu0 %v3785_v7, %s3686_s23 }
 0x868   :  { %v775_v30 = vpop.xlane.xlu0 %774 }
 0x869   :  { %3593 = vrcp.f32 %v775_v30 }
 0x86c   :  { %v834_v32 = vpop.permute.xlu0 %833 }
 0x86d   :  { %v839_v33 = vsel %vm241_vm3, %v834_v32, 0 }
 0x86e   :  { %3306 = vmatpush3.bf16.msra.mxu0 %v839_v33 }
 0x86f   :  { %3317 = vmatprep.subr.bf16.mxu0 %v3675_v1 }
 0x870   :  { %v938_v40 = vpop.permute.xlu0 %937 }
 0x871   :  { %3308 = vmatmul.mubr.msk.bf16.vlgmr.msra.gmra.mrb[20].mxu0 %vm116_vm2, %v784_v34 }
 0x872   :  { %3319 = vmatprep.mubr.msk.bf16.mxu0 %vm3676_vm0, %v3675_v1 }
 0x873   :  { %v3594_v35 = vpop.eup %3593 }
 0x874   :  { %v781_v37 = vmul.f32 %v3594_v35, %v3590_v26 }
 0x876   :  { %v783_v39 = vpack.c.bf16 %v781_v37, %v781_v37 }
 0x877   :  { %3318 = vmatpush3.bf16.xpose.msra.mxu0 %v945_v38 }
 0x878   :  { %3302 = vmatmul.mubr.msk.bf16.vlgmr.msra.gmra.mrb[32].mxu1 %vm116_vm2, %v783_v39  ;;  %3329 = vmatprep.subr.bf16.mxu0 %v3675_v1 }
 0x879   :  { %3313 = vmatprep.mubr.msk.bf16.mxu1 %vm3676_vm0, %v3675_v1  ;;  %3312 = vmatpush3.bf16.msra.mxu1 %v892_v42 }
 0x87a   :  { %3323 = vmatprep.subr.bf16.mxu1 %v3675_v1 }
 0x87e   :  { %3320 = vmatmul.mubr.msk.bf16.vlgmr.msra.gmra.mrb[24].mxu0 %vm116_vm2, %v938_v40 }
 0x87f   :  { %3331 = vmatprep.mubr.msk.bf16.mxu0 %vm3676_vm0, %v3675_v1 }
 0x944   :  { %v875_v43 = vpop.f32.mrb[20].mxu0 }
 0x945   :  { %v3309_v44 = vpop.f32.mrb[21].mxu0 }
 0x946   :  { %v878_v45 = vpop.f32.mrb[22].mxu0  ;;  %v3003_v44 = vld [vmem:[%s4351_s3] ss:$0 sm:$0xff] }
 0x947   :  { %v3310_v46 = vpop.f32.mrb[23].mxu0 }
 0x94b   :  { %v827_v48 = vpop.f32.mrb[32].mxu1 }
 0x94c   :  { %v3103_v49 = vpack.c.bf16 %v875_v43, %v827_v48  ;;  %v3303_v50 = vpop.f32.mrb[33].mxu1 }
 0x94d   :  { %v830_v51 = vpop.f32.mrb[34].mxu1 }
 0x94e   :  { %v3304_v53 = vpop.f32.mrb[35].mxu1  ;;  %3314 = vmatmul.mubr.msk.bf16.vlgmr.msra.gmra.mrb[36].mxu1 %vm116_vm2, %v3103_v49 }
 0x94f   :  { %3324 = vmatpush3.bf16.xpose.msra.mxu1 %v995_v52  ;;  %3325 = vmatprep.mubr.msk.bf16.mxu1 %vm3676_vm0, %v3675_v1 }
 0x950   :  { %3335 = vmatprep.subr.bf16.mxu1 %v3675_v1 }
 0x951   :  { %v981_v54 = vpop.f32.mrb[24].mxu0 }
 0x952   :  { %v3321_v55 = vpop.f32.mrb[25].mxu0  ;;  %v1037_v56 = vsel %vm116_vm2, %v981_v54, -inf }
 0x953   :  { %1038 = vmax.xlane.f32.xlu0 %v1037_v56  ;;  %v984_v57 = vpop.f32.mrb[26].mxu0 }
 0x954   :  { %v3322_v58 = vpop.f32.mrb[27].mxu0 }
 0x956   :  { %3326 = vmatmul.mubr.msk.bf16.vlgmr.msra.gmra.mrb[40].mxu1 %vm116_vm2, %v988_v59 }
 0x957   :  { %3337 = vmatprep.mubr.msk.bf16.mxu1 %vm3676_vm0, %v3675_v1 }
 0x9e0   :  { %v1039_v60 = vpop.xlane.xlu0 %1038 }
 0x9e1   :  { %v1043_v61 = vsub.f32 %v981_v54, %v1039_v60 }
 0x9e3   :  { %v1045_v62 = vmul.f32 1.442695, %v1043_v61 }
 0x9e5   :  { %3595 = vpow2.f32 %v1045_v62 }
 0x9ef   :  { %v3596_v63 = vpop.eup %3595 }
 0x9f0   :  { %v1049_v0 = vsel %vm116_vm2, %v3596_v63, 0.0 }
 0x9f1   :  { %1050 = vadd.xlane.f32.xlu0 %v1049_v0 }
 0xa21   :  { %v928_v2 = vpop.f32.mrb[36].mxu1 }
 0xa22   :  { %v935_v5 = vadd.f32 %v928_v2, %v3913_v10  ;;  %v3315_v6 = vpop.f32.mrb[37].mxu1  ;;  %v3550_v2 = vld [vmem:[%s4354_s6 + $0x8] sm:$0xff]  }
 0xa23   :  { %v931_v8 = vpop.f32.mrb[38].mxu1  ;;  %v3552_v6 = vld [vmem:[%s4356_s8 + $0x8] sm:$0xff]  }
 0xa24   :  { %v936_v9 = vadd.f32 %v931_v8, %v3915_v14  ;;  %v3316_v12 = vpop.f32.mrb[39].mxu1  ;;  %v3553_v8 = vld [vmem:[%s4356_s8 + $0x10] sm:$0xff]  }
 0xa25   :  { %v3555_v12 = vld [vmem:[%s4356_s8 + $0x20] sm:$0xff]  }
 0xa29   :  { %v1031_v13 = vpop.f32.mrb[40].mxu1 }
 0xa2a   :  { %v3327_v15 = vpop.f32.mrb[41].mxu1  ;;  %v1040_v16 = vsel %vm116_vm2, %v1031_v13, -inf }
 0xa2b   :  { %1041 = vmax.xlane.f32.xlu1 %v1040_v16  ;;  %v1034_v17 = vpop.f32.mrb[42].mxu1 }
 0xa2c   :  { %v3328_v18 = vpop.f32.mrb[43].mxu1 }
 0xa3c   :  { %1061 = vrot.lane.b32.xlu1 %v3785_v7, %s3687_s26 }
 0xa7e   :  { %v1051_v19 = vpop.xlane.xlu0 %1050 }
 0xa7f   :  { %3597 = vrcp.f32 %v1051_v19 }
 0xa89   :  { %v3598_v20 = vpop.eup %3597 }
 0xa8a   :  { %v1057_v22 = vmul.f32 %v3598_v20, %v3596_v63 }
 0xa8c   :  { %v1059_v25 = vpack.c.bf16 %v1057_v22, %v1057_v22 }
 0xab8   :  { %v1042_v10 = vpop.xlane.xlu1 %1041 }
 0xab9   :  { %v1044_v21 = vsub.f32 %v1031_v13, %v1042_v10  ;;  %v3556_v13 = vld [vmem:[%s4356_s8 + $0x28] sm:$0xff]  }
 0xabb   :  { %v1047_v23 = vmul.f32 1.442695, %v1044_v21  ;;  %v3004_v21 = vld [vmem:[%s4352_s4] ss:$0 sm:$0xff] }
 0xabc   :  { %v1062_v14 = vpop.permute.xlu1 %1061 }
 0xabd   :  { %3599 = vpow2.f32 %v1047_v23  ;;  %v1067_v24 = vsel %vm241_vm3, %v1062_v14, 0 }
 0xabe   :  { %3330 = vmatpush3.bf16.msra.mxu0 %v1067_v24 }
 0xabf   :  { %3341 = vmatprep.subr.bf16.mxu0 %v3675_v1 }
 0xac1   :  { %3332 = vmatmul.mubr.msk.bf16.vlgmr.msra.gmra.mrb[28].mxu0 %vm116_vm2, %v1059_v25  ;;  %v3005_v25 = vld [vmem:[%s4353_s5] ss:$0 sm:$0xff] }
 0xac2   :  { %3343 = vmatprep.mubr.msk.bf16.mxu0 %vm3676_vm0, %v3675_v1  ;;  %3342 = vmatpush3.bf16.msra.mxu0 %v1168_v28 }
 0xac3   :  { %3355 = vmatprep.subr.bf16.mxu0 %v3675_v1 }
 0xac7   :  { %v3600_v7 = vpop.eup %3599 }
 0xac8   :  { %v1052_v26 = vsel %vm116_vm2, %v3600_v7, 0.0 }
 0xac9   :  { %1053 = vadd.xlane.f32.xlu0 %v1052_v26 }
 0xadf   :  { %1109 = vrot.lane.b32.xlu0 %v3789_v11, %s3687_s26 }
 0xb56   :  { %v1054_v29 = vpop.xlane.xlu0 %1053 }
 0xb57   :  { %3601 = vrcp.f32 %v1054_v29  ;;  %v3557_v29 = vld [vmem:[%s4356_s8 + $0x30] sm:$0xff]  }
 0xb5a   :  { %v1110_v30 = vpop.permute.xlu0 %1109 }
 0xb5b   :  { %v1115_v31 = vsel %vm241_vm3, %v1110_v30, 0  ;;  %v3558_v30 = vld [vmem:[%s4356_s8 + $0x38] sm:$0xff]  }
 0xb5c   :  { %3336 = vmatpush3.bf16.msra.mxu1 %v1115_v31  ;;  %v3006_v31 = vld [vmem:[%s4355_s7] ss:$0 sm:$0xff] }
 0xb5d   :  { %3347 = vmatprep.subr.bf16.mxu1 %v3675_v1 }
 0xb61   :  { %v3602_v32 = vpop.eup %3601 }
 0xb62   :  { %v1058_v33 = vmul.f32 %v3602_v32, %v3600_v7 }
 0xb64   :  { %v1060_v11 = vpack.c.bf16 %v1058_v33, %v1058_v33 }
 0xb66   :  { %3338 = vmatmul.mubr.msk.bf16.vlgmr.msra.gmra.mrb[44].mxu1 %vm116_vm2, %v1060_v11 }
 0xb67   :  { %3351 = vmatprep.mubr.msk.bf16.mxu1 %vm3676_vm0, %v3675_v1 }
 0xb94   :  { %v1103_v34 = vpop.f32.mrb[28].mxu0 }
 0xb95   :  { %v3333_v35 = vpop.f32.mrb[29].mxu0 }
 0xb96   :  { %v1106_v36 = vpop.f32.mrb[30].mxu0 }
 0xb97   :  { %v3334_v37 = vpop.f32.mrb[31].mxu0 }
 0xc39   :  { %v1151_v38 = vpop.f32.mrb[44].mxu1 }
 0xc3a   :  { %v3104_v39 = vpack.c.bf16 %v1151_v38, %v1103_v34  ;;  %v3339_v40 = vpop.f32.mrb[45].mxu1 }
 0xc3b   :  { %v1154_v41 = vpop.f32.mrb[46].mxu1  ;;  %v3010_v40 = vld [vmem:[%s4357_s9] ss:$0 sm:$0xff] }
 0xc3c   :  { %v3340_v42 = vpop.f32.mrb[47].mxu1  ;;  %3344 = vmatmul.mubr.msk.bf16.vlgmr.msra.gmra.mrb[32].mxu0 %vm116_vm2, %v3104_v39 }
 0xc3d   :  { %3371 = vmatprep.mubr.msk.bf16.mxu0 %vm3676_vm0, %v3675_v1 }
 0xd0f   :  { %v1204_v43 = vpop.f32.mrb[32].mxu0 }
 0xd10   :  { %v1211_v45 = vadd.f32 %v1204_v43, %v935_v5  ;;  %v3345_v46 = vpop.f32.mrb[33].mxu0  ;;  %v3551_v5 = vld [vmem:[%s4356_s8] sm:$0xff]  }
 0xd11   :  { %v1207_v47 = vpop.f32.mrb[34].mxu0  ;;  %3356 = vmatpush3.bf16.msra.mxu0 %v3551_v5 }
 0xd12   :  { %v1220_v48 = vadd.f32 %v3003_v44, %v1211_v45  ;;  %v1212_v49 = vadd.f32 %v1207_v47, %v936_v9  ;;  %v3346_v50 = vpop.f32.mrb[35].mxu0  ;;  %3357 = vmatprep.subr.bf16.mxu0 %v3675_v1  ;;  %v3554_v9 = vld [vmem:[%s4356_s8 + $0x18] sm:$0xff]  }
 0xd14   :  { %v1221_v51 = vadd.f32 %v3003_v44, %v1212_v49  ;;  %v1222_v52 = vadd.f32 %v1220_v48, %v3769_v3 }
 0xd15   :  { %3358 = vmatpush3.bf16.msra.mxu0 %v3552_v6 }
 0xd16   :  { %v1224_v53 = vsel %vm62_vm1, %v1222_v52, 0.0  ;;  %v1223_v54 = vadd.f32 %v1221_v51, %v3774_v4  ;;  %v3549_v4 = vld [vmem:[%s4354_s6] sm:$0xff]   ;;  %3359 = vmatprep.subr.bf16.mxu0 %v3675_v1 }
 0xd17   :  { %1225 = vadd.xlane.f32.xlu1 %v1224_v53  ;;  %3348 = vmatpush3.bf16.msra.mxu1 %v3549_v4 }
 0xd18   :  { %v1227_v55 = vsel %vm62_vm1, %v1223_v54, 0.0  ;;  %3349 = vmatprep.subr.bf16.mxu1 %v3675_v1 }
 0xd19   :  { %1228 = vadd.xlane.f32.xlu0 %v1227_v55  ;;  %3360 = vmatpush3.bf16.msra.mxu0 %v3553_v8  ;;  %v3019_v8 = vld [vmem:[%s4358_s10] ss:$0 sm:$0xff] }
 0xd1a   :  { %3361 = vmatprep.subr.bf16.mxu0 %v3675_v1 }
 0xd1b   :  { %3350 = vmatpush3.bf16.msra.mxu1 %v3550_v2 }
 0xd1c   :  { %3375 = vmatprep.subr.bf16.mxu1 %v3675_v1 }
 0xd1d   :  { %3362 = vmatpush3.bf16.msra.mxu0 %v3554_v9 }
 0xd1e   :  { %3363 = vmatprep.subr.bf16.mxu0 %v3675_v1 }
 0xd21   :  { %3364 = vmatpush3.bf16.msra.mxu0 %v3555_v12 }
 0xd22   :  { %3365 = vmatprep.subr.bf16.mxu0 %v3675_v1 }
 0xd25   :  { %3366 = vmatpush3.bf16.msra.mxu0 %v3556_v13 }
 0xd26   :  { %3367 = vmatprep.subr.bf16.mxu0 %v3675_v1 }
 0xd29   :  { %3368 = vmatpush3.bf16.msra.mxu0 %v3557_v29 }
 0xd2a   :  { %3369 = vmatprep.subr.bf16.mxu0 %v3675_v1 }
 0xd2d   :  { %3370 = vmatpush3.bf16.msra.mxu0 %v3558_v30 }
 0xd2e   :  { %3401 = vmatprep.subr.bf16.mxu0 %v3675_v1 }
 0xda4   :  { %v1226_v56 = vpop.xlane.xlu1 %1225 }
 0xda5   :  { %v1231_v57 = vmul.f32 0.03125, %v1226_v56 }
 0xda6   :  { %v1229_v58 = vpop.xlane.xlu0 %1228 }
 0xda7   :  { %v1233_v59 = vsub.f32 %v1222_v52, %v1231_v57  ;;  %v1232_v60 = vmul.f32 0.03125, %v1229_v58 }
 0xda9   :  { %v1234_v61 = vsub.f32 %v1223_v54, %v1232_v60  ;;  %v1235_v62 = vmul.f32 %v1233_v59, %v1233_v59 }
 0xdab   :  { %v1237_v63 = vsel %vm62_vm1, %v1235_v62, 0.0  ;;  %v1236_v0 = vmul.f32 %v1234_v61, %v1234_v61  ;;  %v3560_v62 = vld [vmem:[%s4349_s1 + $0x18] sm:$0xff]  }
 0xdac   :  { %1238 = vadd.xlane.f32.xlu1 %v1237_v63 }
 0xdad   :  { %v1240_v3 = vsel %vm62_vm1, %v1236_v0, 0.0 }
 0xdae   :  { %1241 = vadd.xlane.f32.xlu0 %v1240_v3 }
 0xe39   :  { %v1239_v15 = vpop.xlane.xlu1 %1238 }
 0xe3a   :  { %v1243_v16 = vmul.f32 0.03125, %v1239_v15 }
 0xe3b   :  { %v1242_v17 = vpop.xlane.xlu0 %1241 }
 0xe3c   :  { %v1245_v18 = vadd.f32 1e-05, %v1243_v16  ;;  %v1244_v19 = vmul.f32 0.03125, %v1242_v17  ;;  %v3020_v16 = vld [vmem:[%s4359_s11] ss:$0 sm:$0xff] }
 0xe3e   :  { %3603 = vrsqrt.f32 %v1245_v18  ;;  %v1246_v20 = vadd.f32 1e-05, %v1244_v19 }
 0xe40   :  { %3605 = vrsqrt.f32 %v1246_v20 }
 0xe48   :  { %v3604_v10 = vpop.eup %3603 }
 0xe49   :  { %v1249_v22 = vmul.f32 %v3604_v10, %v1233_v59 }
 0xe4a   :  { %v3606_v23 = vpop.eup %3605 }
 0xe4b   :  { %v1258_v14 = vmul.f32 %v3004_v21, %v1249_v22  ;;  %v1250_v24 = vmul.f32 %v3606_v23, %v1234_v61  ;;  %v3559_v61 = vld [vmem:[%s4349_s1 + $0x10] sm:$0xff]  }
 0xe4d   :  { %v1259_v7 = vmul.f32 %v3004_v21, %v1250_v24  ;;  %v1267_v26 = vadd.f32 %v3005_v25, %v1258_v14 }
 0xe4f   :  { %v1268_v27 = vadd.f32 %v3005_v25, %v1259_v7 }
 0xe51   :  { %v1269_v28 = vpack.c.bf16 %v1268_v27, %v1267_v26 }
 0xe53   :  { %3352 = vmatmul.mubr.msk.bf16.vlgmr.msra.gmra.mrb[48].mxu1 %vm62_vm1, %v1269_v28 }
 0xe54   :  { %3379 = vmatprep.mubr.msk.bf16.mxu1 %vm3676_vm0, %v3675_v1  ;;  %3376 = vmatpush3.bf16.msra.mxu1 %v3559_v61 }
 0xe55   :  { %3377 = vmatprep.subr.bf16.mxu1 %v3675_v1 }
 0xe58   :  { %3378 = vmatpush3.bf16.msra.mxu1 %v3560_v62 }
 0xe59   :  { %3383 = vmatprep.subr.bf16.mxu1 %v3675_v1 }
 0xf26   :  { %v1330_v32 = vpop.f32.mrb[48].mxu1 }
 0xf27   :  { %v1331_v33 = vadd.f32 %v3006_v31, %v1330_v32  ;;  %v3353_v11 = vpop.f32.mrb[49].mxu1 }
 0xf28   :  { %v1333_v34 = vpop.f32.mrb[50].mxu1 }
 0xf29   :  { %v1334_v35 = vadd.f32 %v3006_v31, %v1333_v34  ;;  %v3354_v36 = vpop.f32.mrb[51].mxu1  ;;  %v1337_v37 = vmax.f32 %v1331_v33, 0.0 }
 0xf2b   :  { %v1338_v38 = vmax.f32 %v1334_v35, 0.0 }
 0xf2d   :  { %v1339_v39 = vpack.c.bf16 %v1338_v38, %v1337_v37 }
 0xf2f   :  { %3372 = vmatmul.mubr.bf16.vlgmr.msra.gmra.mrb[36].mxu0 %v1339_v39 }
 0xf30   :  { %3403 = vmatprep.mubr.msk.bf16.mxu0 %vm3676_vm0, %v3675_v1 }
0x1002   :  { %v1445_v41 = vpop.f32.mrb[36].mxu0 }
0x1003   :  { %v1446_v42 = vadd.f32 %v3010_v40, %v1445_v41  ;;  %v3373_v43 = vpop.f32.mrb[37].mxu0 }
0x1004   :  { %v1448_v44 = vpop.f32.mrb[38].mxu0 }
0x1005   :  { %v1449_v45 = vadd.f32 %v3010_v40, %v1448_v44  ;;  %v3374_v46 = vpop.f32.mrb[39].mxu0  ;;  %v1452_v47 = vadd.f32 %v1446_v42, %v1267_v26 }
0x1007   :  { %v1454_v48 = vsel %vm62_vm1, %v1452_v47, 0.0  ;;  %v1453_v49 = vadd.f32 %v1449_v45, %v1268_v27 }
0x1008   :  { %1455 = vadd.xlane.f32.xlu1 %v1454_v48 }
0x1009   :  { %v1457_v50 = vsel %vm62_vm1, %v1453_v49, 0.0 }
0x100a   :  { %1458 = vadd.xlane.f32.xlu0 %v1457_v50 }
0x1095   :  { %v1456_v51 = vpop.xlane.xlu1 %1455 }
0x1096   :  { %v1460_v52 = vmul.f32 0.03125, %v1456_v51 }
0x1097   :  { %v1459_v53 = vpop.xlane.xlu0 %1458 }
0x1098   :  { %v1462_v54 = vsub.f32 %v1452_v47, %v1460_v52  ;;  %v1461_v55 = vmul.f32 0.03125, %v1459_v53 }
0x109a   :  { %v1463_v56 = vsub.f32 %v1453_v49, %v1461_v55  ;;  %v1464_v57 = vmul.f32 %v1462_v54, %v1462_v54 }
0x109c   :  { %v1466_v58 = vsel %vm62_vm1, %v1464_v57, 0.0  ;;  %v1465_v59 = vmul.f32 %v1463_v56, %v1463_v56 }
0x109d   :  { %1467 = vadd.xlane.f32.xlu1 %v1466_v58 }
0x109e   :  { %v1469_v60 = vsel %vm62_vm1, %v1465_v59, 0.0 }
0x109f   :  { %1470 = vadd.xlane.f32.xlu0 %v1469_v60 }
0x112a   :  { %v1468_v63 = vpop.xlane.xlu1 %1467 }
0x112b   :  { %v1472_v0 = vmul.f32 0.03125, %v1468_v63 }
0x112c   :  { %v1471_v3 = vpop.xlane.xlu0 %1470 }
0x112d   :  { %v1474_v4 = vadd.f32 1e-05, %v1472_v0  ;;  %v1473_v2 = vmul.f32 0.03125, %v1471_v3 }
0x112f   :  { %3607 = vrsqrt.f32 %v1474_v4  ;;  %v1475_v5 = vadd.f32 1e-05, %v1473_v2 }
0x1131   :  { %3609 = vrsqrt.f32 %v1475_v5 }
0x1139   :  { %v3608_v6 = vpop.eup %3607 }
0x113a   :  { %v1478_v9 = vmul.f32 %v3608_v6, %v1462_v54 }
0x113b   :  { %v3610_v12 = vpop.eup %3609 }
0x113c   :  { %v1487_v13 = vmul.f32 %v3019_v8, %v1478_v9  ;;  %v1479_v15 = vmul.f32 %v3610_v12, %v1463_v56 }
0x113e   :  { %v1488_v17 = vmul.f32 %v3019_v8, %v1479_v15  ;;  %v4062_v18 = vadd.f32 %v3020_v16, %v1487_v13 }
0x1140   :  { %v4064_v19 = vadd.f32 %v3020_v16, %v1488_v17 }
0x1142   :  { %v1498_v20 = vpack.c.bf16 %v4064_v19, %v4062_v18 }
0x1144   :  { %3380 = vmatmul.mubr.msk.bf16.vlgmr.msra.gmra.mrb[52].mxu1 %vm62_vm1, %v1498_v20 }
0x1145   :  { %3385 = vmatprep.mubr.msk.bf16.mxu1 %vm3676_vm0, %v3675_v1 }
0x1217   :  { %v1553_v10 = vpop.f32.mrb[52].mxu1 }
0x1218   :  { %v4071_v21 = vpack.c.bf16 %v1553_v10, %v1553_v10  ;;  %v3381_v22 = vpop.f32.mrb[53].mxu1 }
0x1219   :  { %v1556_v23 = vpop.f32.mrb[54].mxu1 }
0x121a   :  { %v4073_v14 = vpack.c.bf16 %v1556_v23, %v1556_v23  ;;  %1568 = vrot.lane.b32.xlu1 %v4071_v21, %s3677_s0  ;;  %v3382_v24 = vpop.f32.mrb[55].mxu1 }
0x121c   :  { %1617 = vrot.lane.b32.xlu0 %v4073_v14, %s3677_s0 }
0x128c   :  { %v1569_v25 = vpop.permute.xlu1 %1568 }
0x128d   :  { %v1574_v7 = vsel %vm116_vm2, %v1569_v25, 0 }
0x128e   :  { %3384 = vmatpush3.bf16.xpose.msra.mxu1 %v1574_v7  ;;  %v1618_v26 = vpop.permute.xlu0 %1617 }
0x128f   :  { %3389 = vmatprep.subr.bf16.mxu1 %v3675_v1  ;;  %v1623_v27 = vsel %vm116_vm2, %v1618_v26, 0 }
0x1295   :  { %3386 = vmatmul.mubr.msk.bf16.vlgmr.msra.gmra.mrb[56].mxu1 %vm116_vm2, %v4071_v21 }
0x1296   :  { %3390 = vmatpush3.bf16.xpose.msra.mxu1 %v1623_v27  ;;  %3391 = vmatprep.mubr.msk.bf16.mxu1 %vm3676_vm0, %v3675_v1 }
0x1297   :  { %3395 = vmatprep.subr.bf16.mxu1 %v3675_v1 }
0x129d   :  { %3392 = vmatmul.mubr.msk.bf16.vlgmr.msra.gmra.mrb[60].mxu1 %vm116_vm2, %v4073_v14 }
0x129e   :  { %3397 = vmatprep.mubr.msk.bf16.mxu1 %vm3676_vm0, %v3675_v1 }
0x1368   :  { %v1610_v28 = vpop.f32.mrb[56].mxu1 }
0x1369   :  { %v3387_v29 = vpop.f32.mrb[57].mxu1  ;;  %v1665_v30 = vsel %vm116_vm2, %v1610_v28, -inf }
0x136a   :  { %1666 = vmax.xlane.f32.xlu1 %v1665_v30  ;;  %v1613_v31 = vpop.f32.mrb[58].mxu1 }
0x136b   :  { %v3388_v32 = vpop.f32.mrb[59].mxu1 }
0x1370   :  { %v1659_v33 = vpop.f32.mrb[60].mxu1 }
0x1371   :  { %v3393_v11 = vpop.f32.mrb[61].mxu1  ;;  %v1668_v34 = vsel %vm116_vm2, %v1659_v33, -inf }
0x1372   :  { %1669 = vmax.xlane.f32.xlu0 %v1668_v34  ;;  %v1662_v35 = vpop.f32.mrb[62].mxu1 }
0x1373   :  { %v3394_v36 = vpop.f32.mrb[63].mxu1 }
0x137b   :  { %1689 = vrot.lane.b32.xlu1 %v4071_v21, %s3678_s29 }
0x13f7   :  { %v1667_v37 = vpop.xlane.xlu1 %1666 }
0x13f8   :  { %v1671_v38 = vsub.f32 %v1610_v28, %v1667_v37 }
0x13fa   :  { %v1673_v39 = vmul.f32 1.442695, %v1671_v38 }
0x13fb   :  { %v1690_v40 = vpop.permute.xlu1 %1689 }
0x13fc   :  { %3611 = vpow2.f32 %v1673_v39  ;;  %v1695_v41 = vsel %vm241_vm3, %v1690_v40, 0 }
0x13fd   :  { %3396 = vmatpush3.bf16.msra.mxu1 %v1695_v41 }
0x13fe   :  { %3407 = vmatprep.subr.bf16.mxu1 %v3675_v1 }
0x13ff   :  { %v1670_v42 = vpop.xlane.xlu0 %1669 }
0x1400   :  { %v1672_v43 = vsub.f32 %v1659_v33, %v1670_v42 }
0x1402   :  { %v1675_v44 = vmul.f32 1.442695, %v1672_v43 }
0x1404   :  { %3613 = vpow2.f32 %v1675_v44 }
0x1406   :  { %v3612_v45 = vpop.eup %3611 }
0x1407   :  { %v1677_v46 = vsel %vm116_vm2, %v3612_v45, 0.0 }
0x1408   :  { %1678 = vadd.xlane.f32.xlu1 %v1677_v46 }
0x140e   :  { %v3614_v47 = vpop.eup %3613 }
0x140f   :  { %v1680_v48 = vsel %vm116_vm2, %v3614_v47, 0.0 }
0x1410   :  { %1681 = vadd.xlane.f32.xlu0 %v1680_v48 }
0x1419   :  { %1789 = vrot.lane.b32.xlu1 %v4071_v21, %s3679_s30 }
0x141d   :  { %1839 = vrot.lane.b32.xlu1 %v4073_v14, %s3679_s30 }
0x1421   :  { %1837 = vrot.lane.b32.xlu1 %v4073_v14, %s3680_s13 }
0x1426   :  { %1737 = vrot.lane.b32.xlu0 %v4073_v14, %s3678_s29 }
0x142a   :  { %1787 = vrot.lane.b32.xlu0 %v4071_v21, %s3680_s13 }
0x1495   :  { %v1679_v49 = vpop.xlane.xlu1 %1678 }
0x1496   :  { %3615 = vrcp.f32 %v1679_v49 }
0x1499   :  { %v1790_v54 = vpop.permute.xlu1 %1789 }
0x149a   :  { %v1795_v57 = vsel %vm116_vm2, %v1790_v54, 0 }
0x149d   :  { %v1682_v50 = vpop.xlane.xlu0 %1681  ;;  %v1840_v60 = vpop.permute.xlu1 %1839 }
0x149e   :  { %3617 = vrcp.f32 %v1682_v50  ;;  %v1845_v63 = vsel %vm116_vm2, %v1840_v60, 0 }
0x14a0   :  { %v3616_v51 = vpop.eup %3615 }
0x14a1   :  { %v1685_v52 = vmul.f32 %v3616_v51, %v3612_v45  ;;  %v1738_v53 = vpop.permute.xlu0 %1737  ;;  %v1838_v0 = vpop.permute.xlu1 %1837  ;;  %v3028_v45 = vld [vmem:[%s4350_s2 + $0x10] sm:$0xf] }
0x14a2   :  { %v1743_v55 = vsel %vm241_vm3, %v1738_v53, 0  ;;  %v2070_v48 = vsel %vm241_vm3, %v3028_v45, 0  ;;  %v3029_v53 = vld [vmem:[%s4350_s2 + $0x14] sm:$0xf] }
0x14a3   :  { %3402 = vmatpush3.bf16.msra.mxu0 %v1743_v55  ;;  %v1687_v56 = vpack.c.bf16 %v1685_v52, %v1685_v52  ;;  %v2018_v54 = vsel %vm241_vm3, %v3029_v53, 0 }
0x14a4   :  { %3413 = vmatprep.subr.bf16.mxu0 %v3675_v1 }
0x14a5   :  { %3398 = vmatmul.mubr.msk.bf16.vlgmr.msra.gmra.mrb[64].mxu1 %vm116_vm2, %v1687_v56  ;;  %v1788_v62 = vpop.permute.xlu0 %1787 }
0x14a6   :  { %3408 = vmatpush3.bf16.xpose.msra.mxu1 %v1795_v57  ;;  %3409 = vmatprep.mubr.msk.bf16.mxu1 %vm3676_vm0, %v3675_v1 }
0x14a7   :  { %3419 = vmatprep.subr.bf16.mxu1 %v3675_v1 }
0x14a8   :  { %v3618_v58 = vpop.eup %3617 }
0x14a9   :  { %v1686_v59 = vmul.f32 %v3618_v58, %v3614_v47 }
0x14ab   :  { %v1688_v61 = vpack.c.bf16 %v1686_v59, %v1686_v59 }
0x14ad   :  { %3404 = vmatmul.mubr.msk.bf16.vlgmr.msra.gmra.mrb[40].mxu0 %vm116_vm2, %v1688_v61  ;;  %3410 = vmatmul.mubr.msk.bf16.vlgmr.msra.gmra.mrb[68].mxu1 %vm116_vm2, %v1788_v62 }
0x14ae   :  { %3414 = vmatpush3.bf16.xpose.msra.mxu0 %v1845_v63  ;;  %3415 = vmatprep.mubr.msk.bf16.mxu0 %vm3676_vm0, %v3675_v1 }
0x14af   :  { %3425 = vmatprep.subr.bf16.mxu0 %v3675_v1  ;;  %3421 = vmatprep.mubr.msk.bf16.mxu1 %vm3676_vm0, %v3675_v1 }
0x14b5   :  { %3416 = vmatmul.mubr.msk.bf16.vlgmr.msra.gmra.mrb[44].mxu0 %vm116_vm2, %v1838_v0 }
0x14b6   :  { %3427 = vmatprep.mubr.msk.bf16.mxu0 %vm3676_vm0, %v3675_v1 }
0x1578   :  { %v4127_v3 = vpop.f32.mrb[64].mxu1 }
0x1579   :  { %v3399_v4 = vpop.f32.mrb[65].mxu1 }
0x157a   :  { %v1734_v2 = vpop.f32.mrb[66].mxu1 }
0x157b   :  { %v3400_v5 = vpop.f32.mrb[67].mxu1 }
0x1580   :  { %v4129_v6 = vpop.f32.mrb[40].mxu0  ;;  %v1831_v8 = vpop.f32.mrb[68].mxu1 }
0x1581   :  { %v3106_v9 = vpack.c.bf16 %v4129_v6, %v4127_v3  ;;  %v3405_v12 = vpop.f32.mrb[41].mxu0  ;;  %v3411_v13 = vpop.f32.mrb[69].mxu1  ;;  %v1887_v15 = vsel %vm116_vm2, %v1831_v8, -inf }
0x1582   :  { %v1782_v16 = vpop.f32.mrb[42].mxu0  ;;  %1888 = vmax.xlane.f32.xlu0 %v1887_v15  ;;  %v1834_v17 = vpop.f32.mrb[70].mxu1 }
0x1583   :  { %v3406_v20 = vpop.f32.mrb[43].mxu0  ;;  %v3412_v10 = vpop.f32.mrb[71].mxu1 }
0x1588   :  { %v1881_v22 = vpop.f32.mrb[44].mxu0 }
0x1589   :  { %v3417_v23 = vpop.f32.mrb[45].mxu0  ;;  %v1890_v24 = vsel %vm116_vm2, %v1881_v22, -inf }
0x158a   :  { %1891 = vmax.xlane.f32.xlu1 %v1890_v24  ;;  %v1884_v25 = vpop.f32.mrb[46].mxu0 }
0x158b   :  { %v3418_v7 = vpop.f32.mrb[47].mxu0 }
0x159b   :  { %1911 = vrot.lane.b32.xlu1 %v4071_v21, %s3681_s14 }
0x159f   :  { %2115 = vrot.lane.b32.xlu1 %v4071_v21, %s3683_s16 }
0x15a3   :  { %2165 = vrot.lane.b32.xlu1 %v4073_v14, %s3683_s16 }
0x15a7   :  { %2163 = vrot.lane.b32.xlu1 %v4073_v14, %s3682_s15 }
0x160f   :  { %v1889_v26 = vpop.xlane.xlu0 %1888 }
0x1610   :  { %v1893_v27 = vsub.f32 %v1831_v8, %v1889_v26 }
0x1612   :  { %v1895_v28 = vmul.f32 1.442695, %v1893_v27 }
0x1614   :  { %3619 = vpow2.f32 %v1895_v28 }
0x1617   :  { %v1892_v29 = vpop.xlane.xlu1 %1891 }
0x1618   :  { %v1894_v30 = vsub.f32 %v1881_v22, %v1892_v29 }
0x161a   :  { %v1897_v31 = vmul.f32 1.442695, %v1894_v30 }
0x161b   :  { %v1912_v32 = vpop.permute.xlu1 %1911 }
0x161c   :  { %3621 = vpow2.f32 %v1897_v31  ;;  %v1917_v33 = vsel %vm241_vm3, %v1912_v32, 0 }
0x161d   :  { %3420 = vmatpush3.bf16.msra.mxu1 %v1917_v33 }
0x161e   :  { %v3620_v11 = vpop.eup %3619  ;;  %3431 = vmatprep.subr.bf16.mxu1 %v3675_v1 }
0x161f   :  { %v1899_v34 = vsel %vm116_vm2, %v3620_v11, 0.0  ;;  %v2116_v49 = vpop.permute.xlu1 %2115 }
0x1620   :  { %1900 = vadd.xlane.f32.xlu0 %v1899_v34  ;;  %v2121_v63 = vsel %vm116_vm2, %v2116_v49, 0 }
0x1623   :  { %v2166_v50 = vpop.permute.xlu1 %2165 }
0x1624   :  { %v2171_v51 = vsel %vm116_vm2, %v2166_v50, 0 }
0x1626   :  { %v3622_v35 = vpop.eup %3621 }
0x1627   :  { %v1902_v36 = vsel %vm116_vm2, %v3622_v35, 0.0  ;;  %v2164_v52 = vpop.permute.xlu1 %2163 }
0x1628   :  { %1903 = vadd.xlane.f32.xlu0 %v1902_v36 }
0x163e   :  { %1959 = vrot.lane.b32.xlu0 %v4073_v14, %s3681_s14 }
0x1642   :  { %2113 = vrot.lane.b32.xlu0 %v4071_v21, %s3682_s15 }
0x16ad   :  { %v1901_v37 = vpop.xlane.xlu0 %1900 }
0x16ae   :  { %3623 = vrcp.f32 %v1901_v37 }
0x16b5   :  { %v1904_v38 = vpop.xlane.xlu0 %1903 }
0x16b6   :  { %3625 = vrcp.f32 %v1904_v38 }
0x16b8   :  { %v3624_v39 = vpop.eup %3623 }
0x16b9   :  { %v1907_v40 = vmul.f32 %v3624_v39, %v3620_v11  ;;  %v1960_v41 = vpop.permute.xlu0 %1959 }
0x16ba   :  { %v1965_v42 = vsel %vm241_vm3, %v1960_v41, 0 }
0x16bb   :  { %3426 = vmatpush3.bf16.msra.mxu0 %v1965_v42  ;;  %v1909_v43 = vpack.c.bf16 %v1907_v40, %v1907_v40 }
0x16bc   :  { %3437 = vmatprep.subr.bf16.mxu0 %v3675_v1 }
0x16bd   :  { %3422 = vmatmul.mubr.msk.bf16.vlgmr.msra.gmra.mrb[72].mxu1 %vm116_vm2, %v1909_v43  ;;  %v2114_v2 = vpop.permute.xlu0 %2113 }
0x16be   :  { %3433 = vmatprep.mubr.msk.bf16.mxu1 %vm3676_vm0, %v3675_v1  ;;  %3432 = vmatpush3.bf16.msra.mxu1 %v2018_v54 }
0x16bf   :  { %3443 = vmatprep.subr.bf16.mxu1 %v3675_v1 }
0x16c0   :  { %v3626_v44 = vpop.eup %3625 }
0x16c1   :  { %v1908_v46 = vmul.f32 %v3626_v44, %v3622_v35 }
0x16c3   :  { %v1910_v47 = vpack.c.bf16 %v1908_v46, %v1908_v46 }
0x16c5   :  { %3428 = vmatmul.mubr.msk.bf16.vlgmr.msra.gmra.mrb[48].mxu0 %vm116_vm2, %v1910_v47 }
0x16c6   :  { %3438 = vmatpush3.bf16.msra.mxu0 %v2070_v48  ;;  %3439 = vmatprep.mubr.msk.bf16.mxu0 %vm3676_vm0, %v3675_v1 }
0x16c7   :  { %3449 = vmatprep.subr.bf16.mxu0 %v3675_v1 }
0x16cd   :  { %3440 = vmatmul.mubr.msk.bf16.vlgmr.msra.gmra.mrb[52].mxu0 %vm116_vm2, %v3106_v9 }
0x16ce   :  { %3451 = vmatprep.mubr.msk.bf16.mxu0 %vm3676_vm0, %v3675_v1 }
0x16cf   :  { %3450 = vmatpush3.bf16.xpose.msra.mxu0 %v2171_v51 }
0x16d0   :  { %3461 = vmatprep.subr.bf16.mxu0 %v3675_v1 }
0x16d6   :  { %3452 = vmatmul.mubr.msk.bf16.vlgmr.msra.gmra.mrb[56].mxu0 %vm116_vm2, %v2164_v52  ;;  %v3030_v52 = vld [vmem:[%s4350_s2 + $0x18] sm:$0xf] }
0x16d7   :  { %3463 = vmatprep.mubr.msk.bf16.mxu0 %vm3676_vm0, %v3675_v1  ;;  %v2344_v53 = vsel %vm241_vm3, %v3030_v52, 0 }
0x1790   :  { %v1953_v55 = vpop.f32.mrb[72].mxu1 }
0x1791   :  { %v3423_v56 = vpop.f32.mrb[73].mxu1 }
0x1792   :  { %v1956_v57 = vpop.f32.mrb[74].mxu1 }
0x1793   :  { %v3424_v58 = vpop.f32.mrb[75].mxu1 }
0x1798   :  { %v2001_v59 = vpop.f32.mrb[48].mxu0 }
0x1799   :  { %v3105_v60 = vpack.c.bf16 %v2001_v59, %v1953_v55  ;;  %v3429_v61 = vpop.f32.mrb[49].mxu0 }
0x179a   :  { %v2004_v62 = vpop.f32.mrb[50].mxu0 }
0x179b   :  { %v3430_v0 = vpop.f32.mrb[51].mxu0  ;;  %3434 = vmatmul.mubr.msk.bf16.vlgmr.msra.gmra.mrb[76].mxu1 %vm116_vm2, %v3105_v60 }
0x179c   :  { %3444 = vmatpush3.bf16.xpose.msra.mxu1 %v2121_v63  ;;  %3445 = vmatprep.mubr.msk.bf16.mxu1 %vm3676_vm0, %v3675_v1 }
0x179d   :  { %3455 = vmatprep.subr.bf16.mxu1 %v3675_v1 }
0x17a0   :  { %v2106_v3 = vpop.f32.mrb[52].mxu0 }
0x17a1   :  { %v3441_v4 = vpop.f32.mrb[53].mxu0 }
0x17a2   :  { %v2109_v5 = vpop.f32.mrb[54].mxu0 }
0x17a3   :  { %v3442_v6 = vpop.f32.mrb[55].mxu0  ;;  %3446 = vmatmul.mubr.msk.bf16.vlgmr.msra.gmra.mrb[80].mxu1 %vm116_vm2, %v2114_v2 }
0x17a4   :  { %3457 = vmatprep.mubr.msk.bf16.mxu1 %vm3676_vm0, %v3675_v1 }
0x17a9   :  { %v2207_v8 = vpop.f32.mrb[56].mxu0 }
0x17aa   :  { %v3453_v9 = vpop.f32.mrb[57].mxu0  ;;  %v2216_v12 = vsel %vm116_vm2, %v2207_v8, -inf }
0x17ab   :  { %2217 = vmax.xlane.f32.xlu1 %v2216_v12  ;;  %v2210_v13 = vpop.f32.mrb[58].mxu0 }
0x17ac   :  { %v3454_v15 = vpop.f32.mrb[59].mxu0 }
0x17bc   :  { %2237 = vrot.lane.b32.xlu1 %v4071_v21, %s3684_s21 }
0x17c0   :  { %2391 = vrot.lane.b32.xlu1 %v4071_v21, %s3685_s22 }
0x17c4   :  { %2441 = vrot.lane.b32.xlu1 %v4073_v14, %s3685_s22 }
0x17c8   :  { %2439 = vrot.lane.b32.xlu1 %v4073_v14, %s3686_s23 }
0x1838   :  { %v2218_v16 = vpop.xlane.xlu1 %2217 }
0x1839   :  { %v2220_v10 = vsub.f32 %v2207_v8, %v2218_v16 }
0x183b   :  { %v2223_v22 = vmul.f32 1.442695, %v2220_v10 }
0x183c   :  { %v2238_v17 = vpop.permute.xlu1 %2237 }
0x183d   :  { %v2243_v20 = vsel %vm241_vm3, %v2238_v17, 0  ;;  %3627 = vpow2.f32 %v2223_v22 }
0x183e   :  { %3456 = vmatpush3.bf16.msra.mxu1 %v2243_v20 }
0x183f   :  { %3467 = vmatprep.subr.bf16.mxu1 %v3675_v1 }
0x1840   :  { %v2392_v47 = vpop.permute.xlu1 %2391 }
0x1841   :  { %v2397_v49 = vsel %vm116_vm2, %v2392_v47, 0 }
0x1844   :  { %v2442_v58 = vpop.permute.xlu1 %2441 }
0x1845   :  { %v2447_v63 = vsel %vm116_vm2, %v2442_v58, 0 }
0x1847   :  { %v3628_v31 = vpop.eup %3627 }
0x1848   :  { %v2228_v11 = vsel %vm116_vm2, %v3628_v31, 0.0  ;;  %v2440_v8 = vpop.permute.xlu1 %2439 }
0x186e   :  { %v2054_v23 = vpop.f32.mrb[76].mxu1 }
0x186f   :  { %v4199_v24 = vadd.f32 %v2106_v3, %v2054_v23  ;;  %v3435_v25 = vpop.f32.mrb[77].mxu1 }
0x1870   :  { %v2057_v7 = vpop.f32.mrb[78].mxu1 }
0x1871   :  { %v4201_v26 = vadd.f32 %v2109_v5, %v2057_v7  ;;  %v3436_v27 = vpop.f32.mrb[79].mxu1 }
0x1876   :  { %v2157_v28 = vpop.f32.mrb[80].mxu1 }
0x1877   :  { %v3447_v29 = vpop.f32.mrb[81].mxu1  ;;  %v2213_v30 = vsel %vm116_vm2, %v2157_v28, -inf }
0x1878   :  { %2214 = vmax.xlane.f32.xlu0 %v2213_v30  ;;  %v2160_v32 = vpop.f32.mrb[82].mxu1 }
0x1879   :  { %v3448_v33 = vpop.f32.mrb[83].mxu1 }
0x187c   :  { %2229 = vadd.xlane.f32.xlu0 %v2228_v11 }
0x1905   :  { %v2215_v34 = vpop.xlane.xlu0 %2214 }
0x1906   :  { %v2219_v35 = vsub.f32 %v2157_v28, %v2215_v34 }
0x1908   :  { %v2221_v36 = vmul.f32 1.442695, %v2219_v35 }
0x1909   :  { %v2230_v39 = vpop.xlane.xlu0 %2229 }
0x190a   :  { %3629 = vpow2.f32 %v2221_v36 }
0x190b   :  { %3631 = vrcp.f32 %v2230_v39 }
0x1914   :  { %v3630_v37 = vpop.eup %3629 }
0x1915   :  { %v2225_v38 = vsel %vm116_vm2, %v3630_v37, 0.0  ;;  %v3632_v40 = vpop.eup %3631 }
0x1916   :  { %2226 = vadd.xlane.f32.xlu0 %v2225_v38  ;;  %v2234_v42 = vmul.f32 %v3632_v40, %v3628_v31  ;;  %v3031_v38 = vld [vmem:[%s4350_s2 + $0x1c] sm:$0xf] }
0x1917   :  { %v2620_v39 = vsel %vm241_vm3, %v3031_v38, 0 }
0x1918   :  { %v2236_v45 = vpack.c.bf16 %v2234_v42, %v2234_v42 }
0x192c   :  { %2285 = vrot.lane.b32.xlu0 %v4073_v14, %s3684_s21 }
0x1930   :  { %2389 = vrot.lane.b32.xlu0 %v4071_v21, %s3686_s23 }
0x19a3   :  { %v2227_v41 = vpop.xlane.xlu0 %2226 }
0x19a4   :  { %3633 = vrcp.f32 %v2227_v41 }
0x19a7   :  { %v2286_v43 = vpop.permute.xlu0 %2285 }
0x19a8   :  { %v2291_v44 = vsel %vm241_vm3, %v2286_v43, 0 }
0x19a9   :  { %3462 = vmatpush3.bf16.msra.mxu0 %v2291_v44 }
0x19aa   :  { %3473 = vmatprep.subr.bf16.mxu0 %v3675_v1 }
0x19ab   :  { %v2390_v51 = vpop.permute.xlu0 %2389 }
0x19ac   :  { %3464 = vmatmul.mubr.msk.bf16.vlgmr.msra.gmra.mrb[60].mxu0 %vm116_vm2, %v2236_v45 }
0x19ad   :  { %3475 = vmatprep.mubr.msk.bf16.mxu0 %vm3676_vm0, %v3675_v1 }
0x19ae   :  { %v3634_v46 = vpop.eup %3633 }
0x19af   :  { %v2233_v48 = vmul.f32 %v3634_v46, %v3630_v37 }
0x19b1   :  { %v2235_v50 = vpack.c.bf16 %v2233_v48, %v2233_v48 }
0x19b2   :  { %3474 = vmatpush3.bf16.xpose.msra.mxu0 %v2397_v49 }
0x19b3   :  { %3458 = vmatmul.mubr.msk.bf16.vlgmr.msra.gmra.mrb[84].mxu1 %vm116_vm2, %v2235_v50  ;;  %3485 = vmatprep.subr.bf16.mxu0 %v3675_v1 }
0x19b4   :  { %3469 = vmatprep.mubr.msk.bf16.mxu1 %vm3676_vm0, %v3675_v1  ;;  %3468 = vmatpush3.bf16.msra.mxu1 %v2344_v53 }
0x19b5   :  { %3479 = vmatprep.subr.bf16.mxu1 %v3675_v1 }
0x19b9   :  { %3476 = vmatmul.mubr.msk.bf16.vlgmr.msra.gmra.mrb[64].mxu0 %vm116_vm2, %v2390_v51 }
0x19ba   :  { %3487 = vmatprep.mubr.msk.bf16.mxu0 %vm3676_vm0, %v3675_v1 }
0x1a7f   :  { %v2327_v54 = vpop.f32.mrb[60].mxu0 }
0x1a80   :  { %v3465_v55 = vpop.f32.mrb[61].mxu0 }
0x1a81   :  { %v2330_v56 = vpop.f32.mrb[62].mxu0  ;;  %v3057_v55 = vld [vmem:[%s4351_s3 + $0x1] ss:$0 sm:$0xff] }
0x1a82   :  { %v3466_v57 = vpop.f32.mrb[63].mxu0 }
0x1a86   :  { %v2279_v59 = vpop.f32.mrb[84].mxu1 }
0x1a87   :  { %v3107_v60 = vpack.c.bf16 %v2327_v54, %v2279_v59  ;;  %v3459_v61 = vpop.f32.mrb[85].mxu1 }
0x1a88   :  { %v2282_v62 = vpop.f32.mrb[86].mxu1 }
0x1a89   :  { %v3460_v0 = vpop.f32.mrb[87].mxu1  ;;  %3470 = vmatmul.mubr.msk.bf16.vlgmr.msra.gmra.mrb[88].mxu1 %vm116_vm2, %v3107_v60 }
0x1a8a   :  { %3480 = vmatpush3.bf16.xpose.msra.mxu1 %v2447_v63  ;;  %3481 = vmatprep.mubr.msk.bf16.mxu1 %vm3676_vm0, %v3675_v1 }
0x1a8b   :  { %3491 = vmatprep.subr.bf16.mxu1 %v3675_v1 }
0x1a8c   :  { %v2433_v3 = vpop.f32.mrb[64].mxu0 }
0x1a8d   :  { %v3477_v4 = vpop.f32.mrb[65].mxu0  ;;  %v2489_v2 = vsel %vm116_vm2, %v2433_v3, -inf }
0x1a8e   :  { %2490 = vmax.xlane.f32.xlu0 %v2489_v2  ;;  %v2436_v5 = vpop.f32.mrb[66].mxu0 }
0x1a8f   :  { %v3478_v6 = vpop.f32.mrb[67].mxu0 }
0x1a91   :  { %3482 = vmatmul.mubr.msk.bf16.vlgmr.msra.gmra.mrb[92].mxu1 %vm116_vm2, %v2440_v8 }
0x1a92   :  { %3493 = vmatprep.mubr.msk.bf16.mxu1 %vm3676_vm0, %v3675_v1 }
0x1b1b   :  { %v2491_v9 = vpop.xlane.xlu0 %2490 }
0x1b1c   :  { %v2495_v12 = vsub.f32 %v2433_v3, %v2491_v9 }
0x1b1e   :  { %v2497_v13 = vmul.f32 1.442695, %v2495_v12 }
0x1b20   :  { %3635 = vpow2.f32 %v2497_v13 }
0x1b2a   :  { %v3636_v15 = vpop.eup %3635 }
0x1b2b   :  { %v2501_v16 = vsel %vm116_vm2, %v3636_v15, 0.0 }
0x1b2c   :  { %2502 = vadd.xlane.f32.xlu0 %v2501_v16 }
0x1b5c   :  { %v2380_v17 = vpop.f32.mrb[88].mxu1 }
0x1b5d   :  { %v2387_v20 = vadd.f32 %v2380_v17, %v4199_v24  ;;  %v3471_v10 = vpop.f32.mrb[89].mxu1  ;;  %v3562_v17 = vld [vmem:[%s4354_s6 + $0x18] sm:$0xff]  }
0x1b5e   :  { %v2383_v22 = vpop.f32.mrb[90].mxu1  ;;  %v3564_v10 = vld [vmem:[%s4356_s8 + $0x48] sm:$0xff]  }
0x1b5f   :  { %v2388_v23 = vadd.f32 %v2383_v22, %v4201_v26  ;;  %v3472_v25 = vpop.f32.mrb[91].mxu1  ;;  %v3565_v22 = vld [vmem:[%s4356_s8 + $0x50] sm:$0xff]  }
0x1b60   :  { %v3567_v25 = vld [vmem:[%s4356_s8 + $0x60] sm:$0xff]  }
0x1b64   :  { %v2483_v7 = vpop.f32.mrb[92].mxu1 }
0x1b65   :  { %v3483_v27 = vpop.f32.mrb[93].mxu1  ;;  %v2492_v28 = vsel %vm116_vm2, %v2483_v7, -inf }
0x1b66   :  { %2493 = vmax.xlane.f32.xlu1 %v2492_v28  ;;  %v2486_v29 = vpop.f32.mrb[94].mxu1 }
0x1b67   :  { %v3484_v30 = vpop.f32.mrb[95].mxu1 }
0x1b77   :  { %2513 = vrot.lane.b32.xlu1 %v4071_v21, %s3687_s26 }
0x1bb9   :  { %v2503_v31 = vpop.xlane.xlu0 %2502 }
0x1bba   :  { %3637 = vrcp.f32 %v2503_v31 }
0x1bc4   :  { %v3638_v32 = vpop.eup %3637 }
0x1bc5   :  { %v2509_v11 = vmul.f32 %v3638_v32, %v3636_v15 }
0x1bc7   :  { %v2511_v36 = vpack.c.bf16 %v2509_v11, %v2509_v11 }
0x1bf3   :  { %v2494_v33 = vpop.xlane.xlu1 %2493 }
0x1bf4   :  { %v2496_v24 = vsub.f32 %v2483_v7, %v2494_v33  ;;  %v3568_v7 = vld [vmem:[%s4356_s8 + $0x68] sm:$0xff]  }
0x1bf6   :  { %v2499_v34 = vmul.f32 1.442695, %v2496_v24  ;;  %v3059_v24 = vld [vmem:[%s4352_s4 + $0x1] ss:$0 sm:$0xff] }
0x1bf7   :  { %v2514_v35 = vpop.permute.xlu1 %2513 }
0x1bf8   :  { %3639 = vpow2.f32 %v2499_v34  ;;  %v2519_v26 = vsel %vm241_vm3, %v2514_v35, 0 }
0x1bf9   :  { %3486 = vmatpush3.bf16.msra.mxu0 %v2519_v26 }
0x1bfa   :  { %3497 = vmatprep.subr.bf16.mxu0 %v3675_v1 }
0x1bfc   :  { %3488 = vmatmul.mubr.msk.bf16.vlgmr.msra.gmra.mrb[68].mxu0 %vm116_vm2, %v2511_v36  ;;  %v3061_v36 = vld [vmem:[%s4353_s5 + $0x1] ss:$0 sm:$0xff] }
0x1bfd   :  { %3499 = vmatprep.mubr.msk.bf16.mxu0 %vm3676_vm0, %v3675_v1  ;;  %3498 = vmatpush3.bf16.msra.mxu0 %v2620_v39 }
0x1bfe   :  { %3511 = vmatprep.subr.bf16.mxu0 %v3675_v1 }
0x1c02   :  { %v3640_v21 = vpop.eup %3639 }
0x1c03   :  { %v2504_v37 = vsel %vm116_vm2, %v3640_v21, 0.0 }
0x1c04   :  { %2505 = vadd.xlane.f32.xlu0 %v2504_v37 }
0x1c1a   :  { %2561 = vrot.lane.b32.xlu0 %v4073_v14, %s3687_s26 }
0x1c91   :  { %v2506_v40 = vpop.xlane.xlu0 %2505 }
0x1c92   :  { %3641 = vrcp.f32 %v2506_v40  ;;  %v3569_v40 = vld [vmem:[%s4356_s8 + $0x70] sm:$0xff]  }
0x1c95   :  { %v2562_v41 = vpop.permute.xlu0 %2561 }
0x1c96   :  { %v2567_v42 = vsel %vm241_vm3, %v2562_v41, 0  ;;  %v3570_v41 = vld [vmem:[%s4356_s8 + $0x78] sm:$0xff]  }
0x1c97   :  { %3492 = vmatpush3.bf16.msra.mxu1 %v2567_v42  ;;  %v3067_v42 = vld [vmem:[%s4355_s7 + $0x1] ss:$0 sm:$0xff] }
0x1c98   :  { %3503 = vmatprep.subr.bf16.mxu1 %v3675_v1 }
0x1c9c   :  { %v3642_v43 = vpop.eup %3641 }
0x1c9d   :  { %v2510_v44 = vmul.f32 %v3642_v43, %v3640_v21 }
0x1c9f   :  { %v2512_v14 = vpack.c.bf16 %v2510_v44, %v2510_v44 }
0x1ca1   :  { %3494 = vmatmul.mubr.msk.bf16.vlgmr.msra.gmra.mrb[96].mxu1 %vm116_vm2, %v2512_v14 }
0x1ca2   :  { %3507 = vmatprep.mubr.msk.bf16.mxu1 %vm3676_vm0, %v3675_v1 }
0x1ccf   :  { %v2555_v45 = vpop.f32.mrb[68].mxu0 }
0x1cd0   :  { %v3489_v46 = vpop.f32.mrb[69].mxu0 }
0x1cd1   :  { %v2558_v47 = vpop.f32.mrb[70].mxu0 }
0x1cd2   :  { %v3490_v48 = vpop.f32.mrb[71].mxu0 }
0x1d74   :  { %v2603_v49 = vpop.f32.mrb[96].mxu1 }
0x1d75   :  { %v3108_v50 = vpack.c.bf16 %v2603_v49, %v2555_v45  ;;  %v3495_v51 = vpop.f32.mrb[97].mxu1 }
0x1d76   :  { %v2606_v52 = vpop.f32.mrb[98].mxu1 }
0x1d77   :  { %v3496_v53 = vpop.f32.mrb[99].mxu1  ;;  %3500 = vmatmul.mubr.msk.bf16.vlgmr.msra.gmra.mrb[72].mxu0 %vm116_vm2, %v3108_v50 }
0x1d78   :  { %3527 = vmatprep.mubr.msk.bf16.mxu0 %vm3676_vm0, %v3675_v1 }
0x1e4a   :  { %v2656_v54 = vpop.f32.mrb[72].mxu0 }
0x1e4b   :  { %v2663_v56 = vadd.f32 %v2656_v54, %v2387_v20  ;;  %v3501_v57 = vpop.f32.mrb[73].mxu0  ;;  %v3563_v20 = vld [vmem:[%s4356_s8 + $0x40] sm:$0xff]  }
0x1e4c   :  { %v2659_v58 = vpop.f32.mrb[74].mxu0  ;;  %3512 = vmatpush3.bf16.msra.mxu0 %v3563_v20 }
0x1e4d   :  { %v2673_v59 = vadd.f32 %v3057_v55, %v2663_v56  ;;  %v2664_v60 = vadd.f32 %v2659_v58, %v2388_v23  ;;  %v3502_v61 = vpop.f32.mrb[75].mxu0  ;;  %3513 = vmatprep.subr.bf16.mxu0 %v3675_v1  ;;  %v3566_v23 = vld [vmem:[%s4356_s8 + $0x58] sm:$0xff]  }
0x1e4f   :  { %v2674_v62 = vadd.f32 %v3057_v55, %v2664_v60  ;;  %v2675_v63 = vadd.f32 %v2673_v59, %v4062_v18 }
0x1e50   :  { %3514 = vmatpush3.bf16.msra.mxu0 %v3564_v10 }
0x1e51   :  { %v2677_v0 = vsel %vm62_vm1, %v2675_v63, 0.0  ;;  %v2676_v3 = vadd.f32 %v2674_v62, %v4064_v19  ;;  %v3561_v19 = vld [vmem:[%s4354_s6 + $0x10] sm:$0xff]   ;;  %3515 = vmatprep.subr.bf16.mxu0 %v3675_v1 }
0x1e52   :  { %2678 = vadd.xlane.f32.xlu1 %v2677_v0  ;;  %3504 = vmatpush3.bf16.msra.mxu1 %v3561_v19 }
0x1e53   :  { %v2680_v4 = vsel %vm62_vm1, %v2676_v3, 0.0  ;;  %3505 = vmatprep.subr.bf16.mxu1 %v3675_v1 }
0x1e54   :  { %2681 = vadd.xlane.f32.xlu0 %v2680_v4  ;;  %3516 = vmatpush3.bf16.msra.mxu0 %v3565_v22  ;;  %v3100_v22 = vld [vmem:[%s4359_s11 + $0x1] ss:$0 sm:$0xff] }
0x1e55   :  { %3517 = vmatprep.subr.bf16.mxu0 %v3675_v1 }
0x1e56   :  { %3506 = vmatpush3.bf16.msra.mxu1 %v3562_v17  ;;  %v3098_v17 = vld [vmem:[%s4358_s10 + $0x1] ss:$0 sm:$0xff] }
0x1e58   :  { %3518 = vmatpush3.bf16.msra.mxu0 %v3566_v23 }
0x1e59   :  { %3519 = vmatprep.subr.bf16.mxu0 %v3675_v1 }
0x1e5c   :  { %3520 = vmatpush3.bf16.msra.mxu0 %v3567_v25 }
0x1e5d   :  { %3521 = vmatprep.subr.bf16.mxu0 %v3675_v1 }
0x1e60   :  { %3522 = vmatpush3.bf16.msra.mxu0 %v3568_v7 }
0x1e61   :  { %3523 = vmatprep.subr.bf16.mxu0 %v3675_v1 }
0x1e64   :  { %3524 = vmatpush3.bf16.msra.mxu0 %v3569_v40 }
0x1e65   :  { %3525 = vmatprep.subr.bf16.mxu0 %v3675_v1  ;;  %v3088_v1 = vld [vmem:[%s4357_s9 + $0x1] ss:$0 sm:$0xff] }
0x1e68   :  { %3526 = vmatpush3.bf16.msra.mxu0 %v3570_v41 }
0x1edf   :  { %v2679_v2 = vpop.xlane.xlu1 %2678 }
0x1ee0   :  { %v2683_v5 = vmul.f32 0.03125, %v2679_v2 }
0x1ee1   :  { %v2682_v6 = vpop.xlane.xlu0 %2681 }
0x1ee2   :  { %v2685_v8 = vsub.f32 %v2675_v63, %v2683_v5  ;;  %v2684_v9 = vmul.f32 0.03125, %v2682_v6 }
0x1ee4   :  { %v2686_v12 = vsub.f32 %v2676_v3, %v2684_v9  ;;  %v2687_v13 = vmul.f32 %v2685_v8, %v2685_v8 }
0x1ee6   :  { %v2689_v15 = vsel %vm62_vm1, %v2687_v13, 0.0  ;;  %v2688_v16 = vmul.f32 %v2686_v12, %v2686_v12 }
0x1ee7   :  { %2690 = vadd.xlane.f32.xlu1 %v2689_v15 }
0x1ee8   :  { %v2692_v18 = vsel %vm62_vm1, %v2688_v16, 0.0 }
0x1ee9   :  { %2693 = vadd.xlane.f32.xlu0 %v2692_v18 }
0x1f74   :  { %v2691_v27 = vpop.xlane.xlu1 %2690 }
0x1f75   :  { %v2695_v28 = vmul.f32 0.03125, %v2691_v27 }
0x1f76   :  { %v2694_v29 = vpop.xlane.xlu0 %2693 }
0x1f77   :  { %v2697_v30 = vadd.f32 1e-05, %v2695_v28  ;;  %v2696_v31 = vmul.f32 0.03125, %v2694_v29 }
0x1f79   :  { %3643 = vrsqrt.f32 %v2697_v30  ;;  %v2698_v32 = vadd.f32 1e-05, %v2696_v31 }
0x1f7b   :  { %3645 = vrsqrt.f32 %v2698_v32 }
0x1f83   :  { %v3644_v33 = vpop.eup %3643 }
0x1f84   :  { %v2701_v11 = vmul.f32 %v3644_v33, %v2685_v8 }
0x1f85   :  { %v3646_v34 = vpop.eup %3645 }
0x1f86   :  { %v2711_v35 = vmul.f32 %v3059_v24, %v2701_v11  ;;  %v2702_v26 = vmul.f32 %v3646_v34, %v2686_v12 }
0x1f88   :  { %v2712_v21 = vmul.f32 %v3059_v24, %v2702_v26  ;;  %v2721_v37 = vadd.f32 %v3061_v36, %v2711_v35 }
0x1f8a   :  { %v2722_v38 = vadd.f32 %v3061_v36, %v2712_v21 }
0x1f8c   :  { %v2723_v39 = vpack.c.bf16 %v2722_v38, %v2721_v37 }
0x1f8e   :  { %3508 = vmatmul.mubr.msk.bf16.vlgmr.msra.gmra.mrb[100].mxu1 %vm62_vm1, %v2723_v39 }
0x2061   :  { %v2786_v43 = vpop.f32.mrb[100].mxu1 }
0x2062   :  { %v2787_v44 = vadd.f32 %v3067_v42, %v2786_v43  ;;  %v3509_v14 = vpop.f32.mrb[101].mxu1 }
0x2063   :  { %v2789_v45 = vpop.f32.mrb[102].mxu1 }
0x2064   :  { %v2790_v46 = vadd.f32 %v3067_v42, %v2789_v45  ;;  %v3510_v47 = vpop.f32.mrb[103].mxu1  ;;  %v2793_v48 = vmax.f32 %v2787_v44, 0.0 }
0x2066   :  { %v2794_v49 = vmax.f32 %v2790_v46, 0.0 }
0x2068   :  { %v2795_v50 = vpack.c.bf16 %v2794_v49, %v2793_v48 }
0x206a   :  { %3528 = vmatmul.mubr.bf16.vlgmr.msra.gmra.mrb[76].mxu0 %v2795_v50 }
0x213d   :  { %v2903_v51 = vpop.f32.mrb[76].mxu0 }
0x213e   :  { %v2904_v52 = vadd.f32 %v3088_v1, %v2903_v51  ;;  %v3529_v53 = vpop.f32.mrb[77].mxu0 }
0x213f   :  { %v2906_v54 = vpop.f32.mrb[78].mxu0 }
0x2140   :  { %v2907_v55 = vadd.f32 %v3088_v1, %v2906_v54  ;;  %v3530_v56 = vpop.f32.mrb[79].mxu0  ;;  %v2910_v57 = vadd.f32 %v2904_v52, %v2721_v37 }
0x2142   :  { %v2912_v58 = vsel %vm62_vm1, %v2910_v57, 0.0  ;;  %v2911_v59 = vadd.f32 %v2907_v55, %v2722_v38 }
0x2143   :  { %2913 = vadd.xlane.f32.xlu1 %v2912_v58 }
0x2144   :  { %v2915_v60 = vsel %vm62_vm1, %v2911_v59, 0.0 }
0x2145   :  { %2916 = vadd.xlane.f32.xlu0 %v2915_v60 }
0x21d0   :  { %v2914_v61 = vpop.xlane.xlu1 %2913 }
0x21d1   :  { %v2918_v62 = vmul.f32 0.03125, %v2914_v61 }
0x21d2   :  { %v2917_v63 = vpop.xlane.xlu0 %2916 }
0x21d3   :  { %v2920_v0 = vsub.f32 %v2910_v57, %v2918_v62  ;;  %v2919_v3 = vmul.f32 0.03125, %v2917_v63 }
0x21d5   :  { %v2921_v4 = vsub.f32 %v2911_v59, %v2919_v3  ;;  %v2922_v2 = vmul.f32 %v2920_v0, %v2920_v0 }
0x21d7   :  { %v2924_v5 = vsel %vm62_vm1, %v2922_v2, 0.0  ;;  %v2923_v6 = vmul.f32 %v2921_v4, %v2921_v4 }
0x21d8   :  { %2925 = vadd.xlane.f32.xlu1 %v2924_v5 }
0x21d9   :  { %v2927_v8 = vsel %vm62_vm1, %v2923_v6, 0.0 }
0x21da   :  { %2928 = vadd.xlane.f32.xlu0 %v2927_v8 }
0x2265   :  { %v2926_v9 = vpop.xlane.xlu1 %2925 }
0x2266   :  { %v2930_v12 = vmul.f32 0.03125, %v2926_v9 }
0x2267   :  { %v2929_v13 = vpop.xlane.xlu0 %2928 }
0x2268   :  { %v2932_v15 = vadd.f32 1e-05, %v2930_v12  ;;  %v2931_v16 = vmul.f32 0.03125, %v2929_v13 }
0x226a   :  { %3647 = vrsqrt.f32 %v2932_v15  ;;  %v2933_v18 = vadd.f32 1e-05, %v2931_v16 }
0x226c   :  { %3649 = vrsqrt.f32 %v2933_v18 }
0x2274   :  { %v3648_v19 = vpop.eup %3647 }
0x2275   :  { %v2936_v20 = vmul.f32 %v3648_v19, %v2920_v0 }
0x2276   :  { %v3650_v10 = vpop.eup %3649 }
0x2277   :  { %v2937_v23 = vmul.f32 %v3650_v10, %v2921_v4  ;;  %v2946_v25 = vmul.f32 %v3098_v17, %v2936_v20 }
0x2279   :  { %v2947_v7 = vmul.f32 %v3098_v17, %v2937_v23  ;;  %v2956_v27 = vadd.f32 %v3100_v22, %v2946_v25 }
0x227b   :  { %v2957_v28 = vadd.f32 %v3100_v22, %v2947_v7  ;;  %2958 = vst.msk [vmem:[#allocation2] sm:$0xff] %vm62_vm1, %v2956_v27 }
0x227d   :  { %2959 = vst.msk [vmem:[#allocation2 + $0x8] sm:$0xff] %vm62_vm1, %v2957_v28 }
0x227e   :  { %3662 = shalt.err (!%p3659_p4)
}
0x227f   :  { %s3663_s18 = scalar_lea.hbm %s4360_s12, 256 }
0x2280   :  { %p3664_p5 = scmp.ne.s32.totalorder %s4360_s12, %s3663_s18  ;;  %p3667_p6 = scmp.lt.u32.totalorder %s3663_s18, %s4360_s12 }
0x2282   :  { %p3669_p7 = pnand %p3667_p6, %p3664_p5 }
0x2284   :  { %3672 = shalt.err (!%p3669_p7)
}
0x2285   :  { %s3689_s24 = smov 128   ;;  %s3690_s0 = smov 8  }
0x2286   :  { %2971 = dma.vmem_to_hbm [thread:$0]  %s2966_s28, 256, %s4360_s12, [#allocation3], %s3689_s24, %s3689_s24, %s3690_s0  }
0x2287   :  { %3673 = dma.done.wait [#allocation3], 256  }
0x2288   :  { %3674 = vsyncadd [#allocation3], 4294967040 }
0x2289   :  { %2975 = vsyncpa [#allocation3], 1 }

</bundles_post_ra>
